<compile_context>
chip_gen: v5e
topology: v5e:2x2
jax: 0.10.0
libtpu: 0.0.40
codegen_flags: <defaults>
</compile_context>

<pallas_src>
import functools

import jax
import jax.numpy as jnp
from jax.experimental import pallas as pl
from jax.experimental.pallas import tpu as pltpu

EPS = 1e-5

# MXU operand dtype for the 3x3 convs and storage dtype of the intermediate
# conv outputs.  bf16 gives ~2-4x MXU throughput and halves the HBM traffic of
# the two largest intermediates; set both to jnp.float32 for near-exact parity.
MXU_DTYPE = jnp.bfloat16
Y_DTYPE = jnp.bfloat16


@functools.lru_cache(maxsize=None)
def _vmem_limit_bytes():
    # 32 MiB is safe on every generation (v7x has only 64 MiB physical VMEM);
    # on 128 MiB chips (v5e/v6e) allow larger resident blocks.
    try:
        if pltpu.get_tpu_info().vmem_capacity_bytes >= 128 * 1024 * 1024:
            return 64 * 1024 * 1024
    except Exception:
        pass
    return 32 * 1024 * 1024


def _cparams(dims):
    return pltpu.CompilerParams(dimension_semantics=dims,
                                vmem_limit_bytes=_vmem_limit_bytes())


def _lane_tile(n, cap):
    """Largest multiple-of-128 divisor of n that is <= cap (else n itself)."""
    if n <= cap:
        return n
    t = (cap // 128) * 128
    while t >= 128:
        if n % t == 0:
            return t
        t -= 128
    return n  # TODO(synk): cdiv + masked tail for awkward lane extents.


# ----------------------------------------------------------------------------
# Pallas kernels
# ----------------------------------------------------------------------------
def _stats_kernel(x_ref, o_ref):
    """Per-row [sum, sum_sq] of an (R, HW) slab, accumulated across lane tiles
    (grid axis 0, 'arbitrary'); the (R, 2) output block stays resident."""
    @pl.when(pl.program_id(0) == 0)
    def _():
        o_ref[...] = jnp.zeros_like(o_ref)
    x = x_ref[...].astype(jnp.float32)
    o_ref[:, 0:1] += jnp.sum(x, axis=1, keepdims=True)
    o_ref[:, 1:2] += jnp.sum(x * x, axis=1, keepdims=True)


def _bn_conv_stats_kernel(x_ref, w_ref, ss_ref, y_ref, st_ref, pad_ref, s_ref,
                          *, H, W, relu):
    """Fused: BN-apply (precomputed scale/shift) [+ReLU] -> 3x3 'same' conv as
    ONE MXU matmul with K = 9*Cin -> per-image partial per-channel stats of the
    conv output (for the next training-mode BatchNorm).

      x_ref  : (1, Cin, H*W)        image (channels on sublanes, pixels on lanes)
      w_ref  : (Cout, 9*Cin)        weights, tap-major columns ((kh*3+kw)*Cin+ci)
      ss_ref : (Cin, 2)             [scale | shift] of the preceding BatchNorm
      y_ref  : (1, Cout, H*W)       conv output (bias dropped: cancelled by BN)
      st_ref : (1, Cout, 2)         per-image [sum | sum_sq] of the conv output
      pad_ref: (Cin, H*W + 2*(W+1)) zero-bordered flat row buffer (VMEM halo)
      s_ref  : (9*Cin, H*W)         im2col matrix (MXU operand dtype)
    """
    cin = x_ref.shape[1]
    hw = H * W
    b = W + 1                                   # flat zero-border width

    # BN apply (single f32 FMA per element) [+ ReLU].
    x = x_ref[0].astype(jnp.float32)            # (Cin, HW)
    t = x * ss_ref[:, 0:1] + ss_ref[:, 1:2]
    if relu:
        t = jnp.maximum(t, 0.0)

    # Zero-bordered flat buffer: padding is zero *after* BN/ReLU, and a border
    # of W+1 lanes absorbs every out-of-image row access of the 3x3 taps.
    pad_ref[...] = jnp.zeros_like(pad_ref)
    pad_ref[:, b:b + hw] = t

    # Column-boundary masks (the only masking needed; rows use the zero border).
    ww = jax.lax.broadcasted_iota(jnp.int32, (1, hw), 1) % W
    ok_l = ww >= 1                              # source column w-1 in-bounds
    ok_r = ww <= W - 2                          # source column w+1 in-bounds

    # Build the (9*Cin, HW) im2col operand with 9 flat lane shifts.
    for kh in range(3):
        for kw in range(3):
            d = (kh - 1) * W + (kw - 1)
            piece = pad_ref[:, b + d:b + d + hw]        # (Cin, HW) f32
            if kw == 0:
                piece = jnp.where(ok_l, piece, 0.0)
            elif kw == 2:
                piece = jnp.where(ok_r, piece, 0.0)
            tap = kh * 3 + kw
            s_ref[tap * cin:(tap + 1) * cin, :] = piece.astype(s_ref.dtype)

    # One MXU matmul, K = 9*Cin, N = H*W lanes, f32 accumulation.
    acc = jnp.dot(w_ref[...], s_ref[...], preferred_element_type=jnp.float32)

    y_ref[...] = acc[None].astype(y_ref.dtype)
    st_ref[0:1, :, 0:1] = jnp.sum(acc, axis=1, keepdims=True)[None]
    st_ref[0:1, :, 1:2] = jnp.sum(acc * acc, axis=1, keepdims=True)[None]


def _bn_add_kernel(y_ref, x_ref, ss_ref, o_ref):
    """out = x + scale*y + shift (per-channel), lane-dense over H*W."""
    y = y_ref[0].astype(jnp.float32)
    x = x_ref[0].astype(jnp.float32)
    o_ref[...] = (x + y * ss_ref[:, 0:1] + ss_ref[:, 1:2])[None].astype(o_ref.dtype)


# ----------------------------------------------------------------------------
# Wrappers
# ----------------------------------------------------------------------------
def _channel_stats(x_rows):
    """Per-row [sum, sum_sq] of an (R, HW) slab (single pass, f32 accum)."""
    R, HW = x_rows.shape
    TL = _lane_tile(HW, 8192)
    return pl.pallas_call(
        _stats_kernel,
        out_shape=jax.ShapeDtypeStruct((R, 2), jnp.float32),
        grid=(HW // TL,),
        in_specs=[pl.BlockSpec((R, TL), lambda i: (0, i))],
        out_specs=pl.BlockSpec((R, 2), lambda i: (0, 0)),
        compiler_params=_cparams(("arbitrary",)),
    )(x_rows)


def _scale_shift(stats, count, gamma, beta):
    """(C, 2) [scale | shift] from per-channel (sum, sum_sq) training-mode BN."""
    s, sq = stats[:, 0], stats[:, 1]
    mean = s / count
    var = sq / count - mean * mean          # biased variance (training BN)
    scale = gamma * jax.lax.rsqrt(var + EPS)
    shift = beta - mean * scale
    return jnp.stack([scale, shift], axis=1)


def _bn_conv_stats(x_nc_hw, w_mat, ss, *, H, W, relu):
    """Fused BN-apply [+ReLU] + 3x3 conv + next-BN partial stats, per image."""
    N, Cin, HW = x_nc_hw.shape
    Cout = w_mat.shape[0]
    kern = functools.partial(_bn_conv_stats_kernel, H=H, W=W, relu=relu)
    # TODO(synk): for large H*W, row-tile the grid (halo rows) so blocks fit
    # v7x's 64 MiB VMEM and each TensorCore gets multiple steps to pipeline.
    y, st = pl.pallas_call(
        kern,
        out_shape=(jax.ShapeDtypeStruct((N, Cout, HW), Y_DTYPE),
                   jax.ShapeDtypeStruct((N, Cout, 2), jnp.float32)),
        grid=(N,),
        in_specs=[pl.BlockSpec((1, Cin, HW), lambda n: (n, 0, 0)),
                  pl.BlockSpec((Cout, 9 * Cin), lambda n: (0, 0)),
                  pl.BlockSpec((Cin, 2), lambda n: (0, 0))],
        out_specs=(pl.BlockSpec((1, Cout, HW), lambda n: (n, 0, 0)),
                   pl.BlockSpec((1, Cout, 2), lambda n: (n, 0, 0))),
        scratch_shapes=[pltpu.VMEM((Cin, HW + 2 * (W + 1)), jnp.float32),
                        pltpu.VMEM((9 * Cin, HW), MXU_DTYPE)],
        compiler_params=_cparams(("parallel",)),
    )(x_nc_hw, w_mat, ss)
    return y, jnp.sum(st, axis=0)           # (Cout, 2) summed over batch


def _bn_add(y, x, ss):
    """out = x + scale*y + shift in (N, C, H*W) layout (NCHW-native)."""
    N, C, HW = x.shape
    TL = _lane_tile(HW, 4096)
    return pl.pallas_call(
        _bn_add_kernel,
        out_shape=jax.ShapeDtypeStruct((N, C, HW), x.dtype),
        grid=(N, HW // TL),
        in_specs=[pl.BlockSpec((1, C, TL), lambda n, l: (n, 0, l)),
                  pl.BlockSpec((1, C, TL), lambda n, l: (n, 0, l)),
                  pl.BlockSpec((C, 2), lambda n, l: (0, 0))],
        out_specs=pl.BlockSpec((1, C, TL), lambda n, l: (n, 0, l)),
        compiler_params=_cparams(("parallel", "parallel")),
    )(y, x, ss)


def resblock_forward(x_nchw, p):
    """Pallas ResBlock.forward (stride=1, dilation=1, downsample=None,
    BatchNorm2d in training mode).  Input/output layout: NCHW, like PyTorch."""
    N, C, H, W = x_nchw.shape
    HW = H * W
    M = N * HW
    x3 = x_nchw.reshape(N, C, HW)                     # free NCHW view

    # OIHW -> (Cout, 9*Cin), tap-major columns; bf16 MXU operands.  Conv biases
    # are dropped: a per-channel constant preceding a training-mode BatchNorm
    # is exactly cancelled by its mean subtraction.
    w1 = jnp.transpose(p["w1"], (0, 2, 3, 1)).reshape(C, 9 * C).astype(MXU_DTYPE)
    w2 = jnp.transpose(p["w2"], (0, 2, 3, 1)).reshape(C, 9 * C).astype(MXU_DTYPE)

    # BN1 statistics (one pass, lane-dense (N*C, H*W) layout).
    # NOTE: single-pass var = E[x^2]-E[x]^2 in f32; fine at these scales.
    st1 = _channel_stats(x_nchw.reshape(N * C, HW)).reshape(N, C, 2).sum(axis=0)
    ss1 = _scale_shift(st1, M, p["g1"], p["b1"])

    # BN1-apply + conv1 + BN2 partial stats (single fused pass over x).
    y1, st2 = _bn_conv_stats(x3, w1, ss1, H=H, W=W, relu=False)
    ss2 = _scale_shift(st2, M, p["g2"], p["b2"])

    # BN2-apply + ReLU + conv2 + BN3 partial stats (single fused pass over y1).
    y2, st3 = _bn_conv_stats(y1, w2, ss2, H=H, W=W, relu=True)
    ss3 = _scale_shift(st3, M, p["g3"], p["b3"])

    # BN3-apply + residual add, written straight back in NCHW.
    return _bn_add(y2, x3, ss3).reshape(N, C, H, W)


# ----------------------------------------------------------------------------
# Pure-JAX reference (for verification)
# ----------------------------------------------------------------------------
def resblock_reference(x, p):
    def bn(t, g, b):
        m = t.mean(axis=(0, 2, 3), keepdims=True)
        v = ((t - m) ** 2).mean(axis=(0, 2, 3), keepdims=True)
        return (t - m) * jax.lax.rsqrt(v + EPS) * g[None, :, None, None] \
            + b[None, :, None, None]

    def conv(t, w, b):
        return jax.lax.conv_general_dilated(
            t, w, window_strides=(1, 1), padding=((1, 1), (1, 1)),
            dimension_numbers=("NCHW", "OIHW", "NCHW"),
            precision=jax.lax.Precision.HIGHEST) + b[None, :, None, None]

    out = bn(x, p["g1"], p["b1"])
    out = conv(out, p["w1"], p["cb1"])
    out = bn(out, p["g2"], p["b2"])
    out = jnp.maximum(out, 0.0)
    out = conv(out, p["w2"], p["cb2"])
    out = bn(out, p["g3"], p["b3"])
    return x + out


# ----------------------------------------------------------------------------
if __name__ == "__main__":
    N, C, H, W = 2, 4, 16, 16            # in_channel == out_channel == 4
    key = jax.random.PRNGKey(0)
    ks = jax.random.split(key, 11)

    params = {
        # conv weights (PyTorch OIHW) and biases
        "w1": 0.1 * jax.random.normal(ks[0], (C, C, 3, 3), jnp.float32),
        "cb1": 0.1 * jax.random.normal(ks[1], (C,), jnp.float32),
        "w2": 0.1 * jax.random.normal(ks[2], (C, C, 3, 3), jnp.float32),
        "cb2": 0.1 * jax.random.normal(ks[3], (C,), jnp.float32),
        # BatchNorm affine params (self.bn, conv[1], conv[4])
        "g1": 1.0 + 0.1 * jax.random.normal(ks[4], (C,), jnp.float32),
        "b1": 0.1 * jax.random.normal(ks[5], (C,), jnp.float32),
        "g2": 1.0 + 0.1 * jax.random.normal(ks[6], (C,), jnp.float32),
        "b2": 0.1 * jax.random.normal(ks[7], (C,), jnp.float32),
        "g3": 1.0 + 0.1 * jax.random.normal(ks[8], (C,), jnp.float32),
        "b3": 0.1 * jax.random.normal(ks[9], (C,), jnp.float32),
    }
    x = jax.random.normal(ks[10], (N, C, H, W), jnp.float32)

    out = jax.jit(resblock_forward)(x, params)
    out = jax.block_until_ready(out)

    ref = resblock_reference(x, params)
    assert out.shape == ref.shape == (N, C, H, W)
    exact = (MXU_DTYPE == jnp.float32) and (Y_DTYPE == jnp.float32)
    tol = 5e-3 if exact else 5e-2
    assert jnp.allclose(out, ref, rtol=tol, atol=tol), (
        float(jnp.max(jnp.abs(out - ref))))

    print("KERNEL_OK")
</pallas_src>

<mosaic_0001>
module attributes {stable_mosaic.version = 11 : i64} {
  func.func @_stats_kernel(%arg0: i32, %arg1: memref<8x256xf32, #tpu.memory_space<vmem>>, %arg2: memref<8x2xf32, #tpu.memory_space<vmem>>) attributes {dimension_semantics = [#tpu.dimension_semantics<arbitrary>], iteration_bounds = array<i64: 1>, scalar_prefetch = 0 : i64, scratch_operands = 0 : i64, tpu.core_type = #tpu.core_type<tc>, window_params = [{transform_indices = @transform_0, window_bounds = array<i64: 8, 256>}, {pipeline_mode = #tpu.pipeline_mode<synchronous>, transform_indices = @transform_1, window_bounds = array<i64: 8, 2>}]} {
    %c0_i32 = arith.constant 0 : i32
    %0 = arith.cmpi eq, %arg0, %c0_i32 : i32
    %1 = arith.extui %0 : i1 to i32
    %c0_i32_0 = arith.constant 0 : i32
    %2 = arith.cmpi ne, %1, %c0_i32_0 : i32
    scf.if %2 {
      %cst_10 = arith.constant 0.000000e+00 : f32
      %15 = vector.broadcast %cst_10 : f32 to vector<8x2xf32>
      %c0_11 = arith.constant 0 : index
      %c0_12 = arith.constant 0 : index
      %16 = vector.load %arg2[%c0_11, %c0_12] : memref<8x2xf32, #tpu.memory_space<vmem>>, vector<8x2xf32>
      tpu.vector_store %arg2[%c0_11, %c0_12], %15 {strides = array<i32>} : memref<8x2xf32, #tpu.memory_space<vmem>>, vector<8x2xf32>,
    } else {
    }
    %c0 = arith.constant 0 : index
    %c0_1 = arith.constant 0 : index
    %3 = vector.load %arg1[%c0, %c0_1] : memref<8x256xf32, #tpu.memory_space<vmem>>, vector<8x256xf32>
    %c0_2 = arith.constant 0 : index
    %c0_3 = arith.constant 0 : index
    %4 = vector.load %arg2[%c0_2, %c0_3] : memref<8x2xf32, #tpu.memory_space<vmem>>, vector<8x1xf32>
    %cst = arith.constant dense<0.000000e+00> : vector<8xf32>
    %5 = vector.multi_reduction <add>, %3, %cst [1] : vector<8x256xf32> to vector<8xf32>
    %6 = vector.shape_cast %5 : vector<8xf32> to vector<8x1xf32>
    %7 = arith.addf %4, %6 : vector<8x1xf32>
    %c0_4 = arith.constant 0 : index
    %c0_5 = arith.constant 0 : index
    %8 = vector.load %arg2[%c0_4, %c0_5] : memref<8x2xf32, #tpu.memory_space<vmem>>, vector<8x1xf32>
    tpu.vector_store %arg2[%c0_4, %c0_5], %7 {strides = array<i32>} : memref<8x2xf32, #tpu.memory_space<vmem>>, vector<8x1xf32>,
    %c0_6 = arith.constant 0 : index
    %c1 = arith.constant 1 : index
    %9 = vector.load %arg2[%c0_6, %c1] : memref<8x2xf32, #tpu.memory_space<vmem>>, vector<8x1xf32>
    %10 = arith.mulf %3, %3 : vector<8x256xf32>
    %cst_7 = arith.constant dense<0.000000e+00> : vector<8xf32>
    %11 = vector.multi_reduction <add>, %10, %cst_7 [1] : vector<8x256xf32> to vector<8xf32>
    %12 = vector.shape_cast %11 : vector<8xf32> to vector<8x1xf32>
    %13 = arith.addf %9, %12 : vector<8x1xf32>
    %c0_8 = arith.constant 0 : index
    %c1_9 = arith.constant 1 : index
    %14 = vector.load %arg2[%c0_8, %c1_9] : memref<8x2xf32, #tpu.memory_space<vmem>>, vector<8x1xf32>
    tpu.vector_store %arg2[%c0_8, %c1_9], %13 {strides = array<i32>} : memref<8x2xf32, #tpu.memory_space<vmem>>, vector<8x1xf32>,
    return
  }
  func.func @transform_0(%arg0: i32) -> (i32, i32) {
    %c0_i32 = arith.constant 0 : i32
    %c0_i32_0 = arith.constant 0 : i32
    return %c0_i32, %arg0 : i32, i32
  }
  func.func @transform_1(%arg0: i32) -> (i32, i32) {
    %c0_i32 = arith.constant 0 : i32
    %c0_i32_0 = arith.constant 0 : i32
    %c0_i32_1 = arith.constant 0 : i32
    return %c0_i32, %c0_i32_0 : i32, i32
  }
}

module attributes {stable_mosaic.version = 11 : i64} {
  func.func @_bn_conv_stats_kernel(%arg0: i32, %arg1: memref<1x4x256xf32, #tpu.memory_space<vmem>>, %arg2: memref<4x36xbf16, #tpu.memory_space<vmem>>, %arg3: memref<4x2xf32, #tpu.memory_space<vmem>>, %arg4: memref<1x4x256xbf16, #tpu.memory_space<vmem>>, %arg5: memref<1x4x2xf32, #tpu.memory_space<vmem>>, %arg6: memref<4x290xf32, #tpu.memory_space<vmem>>, %arg7: memref<36x256xbf16, #tpu.memory_space<vmem>>) attributes {dimension_semantics = [#tpu.dimension_semantics<parallel>], iteration_bounds = array<i64: 2>, scalar_prefetch = 0 : i64, scratch_operands = 2 : i64, tpu.core_type = #tpu.core_type<tc>, window_params = [{transform_indices = @transform_0, window_bounds = array<i64: 1, 4, 256>}, {pipeline_mode = #tpu.pipeline_mode<synchronous>, transform_indices = @transform_1, window_bounds = array<i64: 4, 36>}, {pipeline_mode = #tpu.pipeline_mode<synchronous>, transform_indices = @transform_2, window_bounds = array<i64: 4, 2>}, {transform_indices = @transform_3, window_bounds = array<i64: 1, 4, 256>}, {transform_indices = @transform_4, window_bounds = array<i64: 1, 4, 2>}]} {
    %c0 = arith.constant 0 : index
    %c0_0 = arith.constant 0 : index
    %c0_1 = arith.constant 0 : index
    %0 = vector.load %arg1[%c0, %c0_0, %c0_1] : memref<1x4x256xf32, #tpu.memory_space<vmem>>, vector<1x4x256xf32>
    %1 = vector.shape_cast %0 : vector<1x4x256xf32> to vector<4x256xf32>
    %c0_2 = arith.constant 0 : index
    %c0_3 = arith.constant 0 : index
    %2 = vector.load %arg3[%c0_2, %c0_3] : memref<4x2xf32, #tpu.memory_space<vmem>>, vector<4x1xf32>
    %3 = vector.broadcast %2 : vector<4x1xf32> to vector<4x256xf32>
    %4 = arith.mulf %1, %3 : vector<4x256xf32>
    %c0_4 = arith.constant 0 : index
    %c1 = arith.constant 1 : index
    %5 = vector.load %arg3[%c0_4, %c1] : memref<4x2xf32, #tpu.memory_space<vmem>>, vector<4x1xf32>
    %6 = vector.broadcast %5 : vector<4x1xf32> to vector<4x256xf32>
    %7 = arith.addf %4, %6 : vector<4x256xf32>
    %cst = arith.constant 0.000000e+00 : f32
    %8 = vector.broadcast %cst : f32 to vector<4x290xf32>
    %c0_5 = arith.constant 0 : index
    %c0_6 = arith.constant 0 : index
    %9 = vector.load %arg6[%c0_5, %c0_6] : memref<4x290xf32, #tpu.memory_space<vmem>>, vector<4x290xf32>
    tpu.vector_store %arg6[%c0_5, %c0_6], %8 {strides = array<i32>} : memref<4x290xf32, #tpu.memory_space<vmem>>, vector<4x290xf32>,
    %c0_7 = arith.constant 0 : index
    %c17 = arith.constant 17 : index
    %10 = vector.load %arg6[%c0_7, %c17] : memref<4x290xf32, #tpu.memory_space<vmem>>, vector<4x256xf32>
    tpu.vector_store %arg6[%c0_7, %c17], %7 {strides = array<i32>} : memref<4x290xf32, #tpu.memory_space<vmem>>, vector<4x256xf32>,
    %11 = tpu.iota {dimensions = array<i32: 1>} : vector<1x256xi32>
    %c16_i32 = arith.constant 16 : i32
    %c0_i32 = arith.constant 0 : i32
    %12 = arith.cmpi eq, %c16_i32, %c0_i32 : i32
    %c1_i32 = arith.constant 1 : i32
    %13 = arith.select %12, %c1_i32, %c16_i32 : i32
    %14 = vector.broadcast %13 : i32 to vector<1x256xi32>
    %15 = arith.remsi %11, %14 : vector<1x256xi32>
    %c0_i32_8 = arith.constant 0 : i32
    %16 = vector.broadcast %c0_i32_8 : i32 to vector<1x256xi32>
    %17 = arith.cmpi ne, %15, %16 : vector<1x256xi32>
    %c0_i32_9 = arith.constant 0 : i32
    %18 = vector.broadcast %c0_i32_9 : i32 to vector<1x256xi32>
    %19 = arith.cmpi slt, %15, %18 : vector<1x256xi32>
    %c0_i32_10 = arith.constant 0 : i32
    %20 = arith.cmpi slt, %13, %c0_i32_10 : i32
    %21 = vector.broadcast %20 : i1 to vector<1x256xi1>
    %22 = vector.broadcast %21 : vector<1x256xi1> to vector<1x256xi1>
    %23 = arith.xori %19, %22 : vector<1x256xi1>
    %24 = arith.andi %23, %17 : vector<1x256xi1>
    %25 = vector.broadcast %13 : i32 to vector<1x256xi32>
    %26 = arith.addi %15, %25 : vector<1x256xi32>
    %27 = arith.select %24, %26, %15 : vector<1x256xi1>, vector<1x256xi32>
    %c1_i32_11 = arith.constant 1 : i32
    %28 = vector.broadcast %c1_i32_11 : i32 to vector<1x256xi32>
    %29 = arith.cmpi sge, %27, %28 : vector<1x256xi32>
    %c14_i32 = arith.constant 14 : i32
    %30 = vector.broadcast %c14_i32 : i32 to vector<1x256xi32>
    %31 = arith.cmpi sle, %27, %30 : vector<1x256xi32>
    %c0_12 = arith.constant 0 : index
    %c0_13 = arith.constant 0 : index
    %32 = vector.load %arg6[%c0_12, %c0_13] : memref<4x290xf32, #tpu.memory_space<vmem>>, vector<4x256xf32>
    %cst_14 = arith.constant 0.000000e+00 : f32
    %33 = vector.shape_cast %29 : vector<1x256xi1> to vector<1x256xi1>
    %34 = vector.broadcast %33 : vector<1x256xi1> to vector<4x256xi1>
    %35 = vector.broadcast %cst_14 : f32 to vector<4x256xf32>
    %36 = arith.select %34, %32, %35 : vector<4x256xi1>, vector<4x256xf32>
    %37 = arith.truncf %36 : vector<4x256xf32> to vector<4x256xbf16>
    %c0_15 = arith.constant 0 : index
    %c0_16 = arith.constant 0 : index
    %38 = vector.load %arg7[%c0_15, %c0_16] : memref<36x256xbf16, #tpu.memory_space<vmem>>, vector<4x256xbf16>
    tpu.vector_store %arg7[%c0_15, %c0_16], %37 {strides = array<i32>} : memref<36x256xbf16, #tpu.memory_space<vmem>>, vector<4x256xbf16>,
    %c0_17 = arith.constant 0 : index
    %c1_18 = arith.constant 1 : index
    %39 = vector.load %arg6[%c0_17, %c1_18] : memref<4x290xf32, #tpu.memory_space<vmem>>, vector<4x256xf32>
    %40 = arith.truncf %39 : vector<4x256xf32> to vector<4x256xbf16>
    %c4 = arith.constant 4 : index
    %c0_19 = arith.constant 0 : index
    %41 = vector.load %arg7[%c4, %c0_19] : memref<36x256xbf16, #tpu.memory_space<vmem>>, vector<4x256xbf16>
    tpu.vector_store %arg7[%c4, %c0_19], %40 {strides = array<i32>} : memref<36x256xbf16, #tpu.memory_space<vmem>>, vector<4x256xbf16>,
    %c0_20 = arith.constant 0 : index
    %c2 = arith.constant 2 : index
    %42 = vector.load %arg6[%c0_20, %c2] : memref<4x290xf32, #tpu.memory_space<vmem>>, vector<4x256xf32>
    %cst_21 = arith.constant 0.000000e+00 : f32
    %43 = vector.shape_cast %31 : vector<1x256xi1> to vector<1x256xi1>
    %44 = vector.broadcast %43 : vector<1x256xi1> to vector<4x256xi1>
    %45 = vector.broadcast %cst_21 : f32 to vector<4x256xf32>
    %46 = arith.select %44, %42, %45 : vector<4x256xi1>, vector<4x256xf32>
    %47 = arith.truncf %46 : vector<4x256xf32> to vector<4x256xbf16>
    %c8 = arith.constant 8 : index
    %c0_22 = arith.constant 0 : index
    %48 = vector.load %arg7[%c8, %c0_22] : memref<36x256xbf16, #tpu.memory_space<vmem>>, vector<4x256xbf16>
    tpu.vector_store %arg7[%c8, %c0_22], %47 {strides = array<i32>} : memref<36x256xbf16, #tpu.memory_space<vmem>>, vector<4x256xbf16>,
    %c0_23 = arith.constant 0 : index
    %c16 = arith.constant 16 : index
    %49 = vector.load %arg6[%c0_23, %c16] : memref<4x290xf32, #tpu.memory_space<vmem>>, vector<4x256xf32>
    %cst_24 = arith.constant 0.000000e+00 : f32
    %50 = vector.shape_cast %29 : vector<1x256xi1> to vector<1x256xi1>
    %51 = vector.broadcast %50 : vector<1x256xi1> to vector<4x256xi1>
    %52 = vector.broadcast %cst_24 : f32 to vector<4x256xf32>
    %53 = arith.select %51, %49, %52 : vector<4x256xi1>, vector<4x256xf32>
    %54 = arith.truncf %53 : vector<4x256xf32> to vector<4x256xbf16>
    %c12 = arith.constant 12 : index
    %c0_25 = arith.constant 0 : index
    %55 = vector.load %arg7[%c12, %c0_25] : memref<36x256xbf16, #tpu.memory_space<vmem>>, vector<4x256xbf16>
    tpu.vector_store %arg7[%c12, %c0_25], %54 {strides = array<i32>} : memref<36x256xbf16, #tpu.memory_space<vmem>>, vector<4x256xbf16>,
    %c0_26 = arith.constant 0 : index
    %c17_27 = arith.constant 17 : index
    %56 = vector.load %arg6[%c0_26, %c17_27] : memref<4x290xf32, #tpu.memory_space<vmem>>, vector<4x256xf32>
    %57 = arith.truncf %56 : vector<4x256xf32> to vector<4x256xbf16>
    %c16_28 = arith.constant 16 : index
    %c0_29 = arith.constant 0 : index
    %58 = vector.load %arg7[%c16_28, %c0_29] : memref<36x256xbf16, #tpu.memory_space<vmem>>, vector<4x256xbf16>
    tpu.vector_store %arg7[%c16_28, %c0_29], %57 {strides = array<i32>} : memref<36x256xbf16, #tpu.memory_space<vmem>>, vector<4x256xbf16>,
    %c0_30 = arith.constant 0 : index
    %c18 = arith.constant 18 : index
    %59 = vector.load %arg6[%c0_30, %c18] : memref<4x290xf32, #tpu.memory_space<vmem>>, vector<4x256xf32>
    %cst_31 = arith.constant 0.000000e+00 : f32
    %60 = vector.shape_cast %31 : vector<1x256xi1> to vector<1x256xi1>
    %61 = vector.broadcast %60 : vector<1x256xi1> to vector<4x256xi1>
    %62 = vector.broadcast %cst_31 : f32 to vector<4x256xf32>
    %63 = arith.select %61, %59, %62 : vector<4x256xi1>, vector<4x256xf32>
    %64 = arith.truncf %63 : vector<4x256xf32> to vector<4x256xbf16>
    %c20 = arith.constant 20 : index
    %c0_32 = arith.constant 0 : index
    %65 = vector.load %arg7[%c20, %c0_32] : memref<36x256xbf16, #tpu.memory_space<vmem>>, vector<4x256xbf16>
    tpu.vector_store %arg7[%c20, %c0_32], %64 {strides = array<i32>} : memref<36x256xbf16, #tpu.memory_space<vmem>>, vector<4x256xbf16>,
    %c0_33 = arith.constant 0 : index
    %c32 = arith.constant 32 : index
    %66 = vector.load %arg6[%c0_33, %c32] : memref<4x290xf32, #tpu.memory_space<vmem>>, vector<4x256xf32>
    %cst_34 = arith.constant 0.000000e+00 : f32
    %67 = vector.shape_cast %29 : vector<1x256xi1> to vector<1x256xi1>
    %68 = vector.broadcast %67 : vector<1x256xi1> to vector<4x256xi1>
    %69 = vector.broadcast %cst_34 : f32 to vector<4x256xf32>
    %70 = arith.select %68, %66, %69 : vector<4x256xi1>, vector<4x256xf32>
    %71 = arith.truncf %70 : vector<4x256xf32> to vector<4x256xbf16>
    %c24 = arith.constant 24 : index
    %c0_35 = arith.constant 0 : index
    %72 = vector.load %arg7[%c24, %c0_35] : memref<36x256xbf16, #tpu.memory_space<vmem>>, vector<4x256xbf16>
    tpu.vector_store %arg7[%c24, %c0_35], %71 {strides = array<i32>} : memref<36x256xbf16, #tpu.memory_space<vmem>>, vector<4x256xbf16>,
    %c0_36 = arith.constant 0 : index
    %c33 = arith.constant 33 : index
    %73 = vector.load %arg6[%c0_36, %c33] : memref<4x290xf32, #tpu.memory_space<vmem>>, vector<4x256xf32>
    %74 = arith.truncf %73 : vector<4x256xf32> to vector<4x256xbf16>
    %c28 = arith.constant 28 : index
    %c0_37 = arith.constant 0 : index
    %75 = vector.load %arg7[%c28, %c0_37] : memref<36x256xbf16, #tpu.memory_space<vmem>>, vector<4x256xbf16>
    tpu.vector_store %arg7[%c28, %c0_37], %74 {strides = array<i32>} : memref<36x256xbf16, #tpu.memory_space<vmem>>, vector<4x256xbf16>,
    %c0_38 = arith.constant 0 : index
    %c34 = arith.constant 34 : index
    %76 = vector.load %arg6[%c0_38, %c34] : memref<4x290xf32, #tpu.memory_space<vmem>>, vector<4x256xf32>
    %cst_39 = arith.constant 0.000000e+00 : f32
    %77 = vector.shape_cast %31 : vector<1x256xi1> to vector<1x256xi1>
    %78 = vector.broadcast %77 : vector<1x256xi1> to vector<4x256xi1>
    %79 = vector.broadcast %cst_39 : f32 to vector<4x256xf32>
    %80 = arith.select %78, %76, %79 : vector<4x256xi1>, vector<4x256xf32>
    %81 = arith.truncf %80 : vector<4x256xf32> to vector<4x256xbf16>
    %c32_40 = arith.constant 32 : index
    %c0_41 = arith.constant 0 : index
    %82 = vector.load %arg7[%c32_40, %c0_41] : memref<36x256xbf16, #tpu.memory_space<vmem>>, vector<4x256xbf16>
    tpu.vector_store %arg7[%c32_40, %c0_41], %81 {strides = array<i32>} : memref<36x256xbf16, #tpu.memory_space<vmem>>, vector<4x256xbf16>,
    %c0_42 = arith.constant 0 : index
    %c0_43 = arith.constant 0 : index
    %83 = vector.load %arg2[%c0_42, %c0_43] : memref<4x36xbf16, #tpu.memory_space<vmem>>, vector<4x36xbf16>
    %c0_44 = arith.constant 0 : index
    %c0_45 = arith.constant 0 : index
    %84 = vector.load %arg7[%c0_44, %c0_45] : memref<36x256xbf16, #tpu.memory_space<vmem>>, vector<36x256xbf16>
    %cst_46 = arith.constant dense<0.000000e+00> : vector<4x256xf32>
    %85 = tpu.matmul %83, %84, %cst_46 {dimension_numbers = #tpu.dot_dimension_numbers<[1], [0], [0], [1], [0, 0, 1, 1], [], []>} : vector<4x36xbf16>, vector<36x256xbf16>, vector<4x256xf32> -> vector<4x256xf32>
    %86 = vector.shape_cast %85 : vector<4x256xf32> to vector<1x4x256xf32>
    %87 = arith.truncf %86 : vector<1x4x256xf32> to vector<1x4x256xbf16>
    %c0_47 = arith.constant 0 : index
    %c0_48 = arith.constant 0 : index
    %c0_49 = arith.constant 0 : index
    %88 = vector.load %arg4[%c0_47, %c0_48, %c0_49] : memref<1x4x256xbf16, #tpu.memory_space<vmem>>, vector<1x4x256xbf16>
    tpu.vector_store %arg4[%c0_47, %c0_48, %c0_49], %87 {strides = array<i32>} : memref<1x4x256xbf16, #tpu.memory_space<vmem>>, vector<1x4x256xbf16>,
    %cst_50 = arith.constant dense<0.000000e+00> : vector<4xf32>
    %89 = vector.multi_reduction <add>, %85, %cst_50 [1] : vector<4x256xf32> to vector<4xf32>
    %90 = vector.shape_cast %89 : vector<4xf32> to vector<4x1xf32>
    %91 = vector.shape_cast %90 : vector<4x1xf32> to vector<1x4x1xf32>
    %c0_51 = arith.constant 0 : index
    %c0_52 = arith.constant 0 : index
    %c0_53 = arith.constant 0 : index
    %92 = vector.load %arg5[%c0_51, %c0_52, %c0_53] : memref<1x4x2xf32, #tpu.memory_space<vmem>>, vector<1x4x1xf32>
    tpu.vector_store %arg5[%c0_51, %c0_52, %c0_53], %91 {strides = array<i32>} : memref<1x4x2xf32, #tpu.memory_space<vmem>>, vector<1x4x1xf32>,
    %93 = arith.mulf %85, %85 : vector<4x256xf32>
    %cst_54 = arith.constant dense<0.000000e+00> : vector<4xf32>
    %94 = vector.multi_reduction <add>, %93, %cst_54 [1] : vector<4x256xf32> to vector<4xf32>
    %95 = vector.shape_cast %94 : vector<4xf32> to vector<4x1xf32>
    %96 = vector.shape_cast %95 : vector<4x1xf32> to vector<1x4x1xf32>
    %c0_55 = arith.constant 0 : index
    %c0_56 = arith.constant 0 : index
    %c1_57 = arith.constant 1 : index
    %97 = vector.load %arg5[%c0_55, %c0_56, %c1_57] : memref<1x4x2xf32, #tpu.memory_space<vmem>>, vector<1x4x1xf32>
    tpu.vector_store %arg5[%c0_55, %c0_56, %c1_57], %96 {strides = array<i32>} : memref<1x4x2xf32, #tpu.memory_space<vmem>>, vector<1x4x1xf32>,
    return
  }
  func.func @transform_0(%arg0: i32) -> (i32, i32, i32) {
    %c0_i32 = arith.constant 0 : i32
    %c0_i32_0 = arith.constant 0 : i32
    %c0_i32_1 = arith.constant 0 : i32
    return %arg0, %c0_i32, %c0_i32_0 : i32, i32, i32
  }
  func.func @transform_1(%arg0: i32) -> (i32, i32) {
    %c0_i32 = arith.constant 0 : i32
    %c0_i32_0 = arith.constant 0 : i32
    %c0_i32_1 = arith.constant 0 : i32
    return %c0_i32, %c0_i32_0 : i32, i32
  }
  func.func @transform_2(%arg0: i32) -> (i32, i32) {
    %c0_i32 = arith.constant 0 : i32
    %c0_i32_0 = arith.constant 0 : i32
    %c0_i32_1 = arith.constant 0 : i32
    return %c0_i32, %c0_i32_0 : i32, i32
  }
  func.func @transform_3(%arg0: i32) -> (i32, i32, i32) {
    %c0_i32 = arith.constant 0 : i32
    %c0_i32_0 = arith.constant 0 : i32
    %c0_i32_1 = arith.constant 0 : i32
    return %arg0, %c0_i32, %c0_i32_0 : i32, i32, i32
  }
  func.func @transform_4(%arg0: i32) -> (i32, i32, i32) {
    %c0_i32 = arith.constant 0 : i32
    %c0_i32_0 = arith.constant 0 : i32
    %c0_i32_1 = arith.constant 0 : i32
    return %arg0, %c0_i32, %c0_i32_0 : i32, i32, i32
  }
}

module attributes {stable_mosaic.version = 11 : i64} {
  func.func @_bn_add_kernel(%arg0: i32, %arg1: i32, %arg2: memref<1x4x256xbf16, #tpu.memory_space<vmem>>, %arg3: memref<1x4x256xf32, #tpu.memory_space<vmem>>, %arg4: memref<4x2xf32, #tpu.memory_space<vmem>>, %arg5: memref<1x4x256xf32, #tpu.memory_space<vmem>>) attributes {dimension_semantics = [#tpu.dimension_semantics<parallel>, #tpu.dimension_semantics<parallel>], iteration_bounds = array<i64: 2, 1>, scalar_prefetch = 0 : i64, scratch_operands = 0 : i64, tpu.core_type = #tpu.core_type<tc>, window_params = [{transform_indices = @transform_0, window_bounds = array<i64: 1, 4, 256>}, {transform_indices = @transform_1, window_bounds = array<i64: 1, 4, 256>}, {pipeline_mode = #tpu.pipeline_mode<synchronous>, transform_indices = @transform_2, window_bounds = array<i64: 4, 2>}, {transform_indices = @transform_3, window_bounds = array<i64: 1, 4, 256>}]} {
    %c0 = arith.constant 0 : index
    %c0_0 = arith.constant 0 : index
    %c0_1 = arith.constant 0 : index
    %0 = vector.load %arg2[%c0, %c0_0, %c0_1] : memref<1x4x256xbf16, #tpu.memory_space<vmem>>, vector<1x4x256xbf16>
    %1 = vector.shape_cast %0 : vector<1x4x256xbf16> to vector<4x256xbf16>
    %2 = arith.extf %1 : vector<4x256xbf16> to vector<4x256xf32>
    %c0_2 = arith.constant 0 : index
    %c0_3 = arith.constant 0 : index
    %c0_4 = arith.constant 0 : index
    %3 = vector.load %arg3[%c0_2, %c0_3, %c0_4] : memref<1x4x256xf32, #tpu.memory_space<vmem>>, vector<1x4x256xf32>
    %4 = vector.shape_cast %3 : vector<1x4x256xf32> to vector<4x256xf32>
    %c0_5 = arith.constant 0 : index
    %c0_6 = arith.constant 0 : index
    %5 = vector.load %arg4[%c0_5, %c0_6] : memref<4x2xf32, #tpu.memory_space<vmem>>, vector<4x1xf32>
    %6 = vector.broadcast %5 : vector<4x1xf32> to vector<4x256xf32>
    %7 = arith.mulf %2, %6 : vector<4x256xf32>
    %8 = arith.addf %4, %7 : vector<4x256xf32>
    %c0_7 = arith.constant 0 : index
    %c1 = arith.constant 1 : index
    %9 = vector.load %arg4[%c0_7, %c1] : memref<4x2xf32, #tpu.memory_space<vmem>>, vector<4x1xf32>
    %10 = vector.broadcast %9 : vector<4x1xf32> to vector<4x256xf32>
    %11 = arith.addf %8, %10 : vector<4x256xf32>
    %12 = vector.shape_cast %11 : vector<4x256xf32> to vector<1x4x256xf32>
    %c0_8 = arith.constant 0 : index
    %c0_9 = arith.constant 0 : index
    %c0_10 = arith.constant 0 : index
    %13 = vector.load %arg5[%c0_8, %c0_9, %c0_10] : memref<1x4x256xf32, #tpu.memory_space<vmem>>, vector<1x4x256xf32>
    tpu.vector_store %arg5[%c0_8, %c0_9, %c0_10], %12 {strides = array<i32>} : memref<1x4x256xf32, #tpu.memory_space<vmem>>, vector<1x4x256xf32>,
    return
  }
  func.func @transform_0(%arg0: i32, %arg1: i32) -> (i32, i32, i32) {
    %c0_i32 = arith.constant 0 : i32
    %c0_i32_0 = arith.constant 0 : i32
    return %arg0, %c0_i32, %arg1 : i32, i32, i32
  }
  func.func @transform_1(%arg0: i32, %arg1: i32) -> (i32, i32, i32) {
    %c0_i32 = arith.constant 0 : i32
    %c0_i32_0 = arith.constant 0 : i32
    return %arg0, %c0_i32, %arg1 : i32, i32, i32
  }
  func.func @transform_2(%arg0: i32, %arg1: i32) -> (i32, i32) {
    %c0_i32 = arith.constant 0 : i32
    %c0_i32_0 = arith.constant 0 : i32
    %c0_i32_1 = arith.constant 0 : i32
    return %c0_i32, %c0_i32_0 : i32, i32
  }
  func.func @transform_3(%arg0: i32, %arg1: i32) -> (i32, i32, i32) {
    %c0_i32 = arith.constant 0 : i32
    %c0_i32_0 = arith.constant 0 : i32
    return %arg0, %c0_i32, %arg1 : i32, i32, i32
  }
}

module attributes {stable_mosaic.version = 11 : i64} {
  func.func @_bn_conv_stats_kernel(%arg0: i32, %arg1: memref<1x4x256xbf16, #tpu.memory_space<vmem>>, %arg2: memref<4x36xbf16, #tpu.memory_space<vmem>>, %arg3: memref<4x2xf32, #tpu.memory_space<vmem>>, %arg4: memref<1x4x256xbf16, #tpu.memory_space<vmem>>, %arg5: memref<1x4x2xf32, #tpu.memory_space<vmem>>, %arg6: memref<4x290xf32, #tpu.memory_space<vmem>>, %arg7: memref<36x256xbf16, #tpu.memory_space<vmem>>) attributes {dimension_semantics = [#tpu.dimension_semantics<parallel>], iteration_bounds = array<i64: 2>, scalar_prefetch = 0 : i64, scratch_operands = 2 : i64, tpu.core_type = #tpu.core_type<tc>, window_params = [{transform_indices = @transform_0, window_bounds = array<i64: 1, 4, 256>}, {pipeline_mode = #tpu.pipeline_mode<synchronous>, transform_indices = @transform_1, window_bounds = array<i64: 4, 36>}, {pipeline_mode = #tpu.pipeline_mode<synchronous>, transform_indices = @transform_2, window_bounds = array<i64: 4, 2>}, {transform_indices = @transform_3, window_bounds = array<i64: 1, 4, 256>}, {transform_indices = @transform_4, window_bounds = array<i64: 1, 4, 2>}]} {
    %c0 = arith.constant 0 : index
    %c0_0 = arith.constant 0 : index
    %c0_1 = arith.constant 0 : index
    %0 = vector.load %arg1[%c0, %c0_0, %c0_1] : memref<1x4x256xbf16, #tpu.memory_space<vmem>>, vector<1x4x256xbf16>
    %1 = vector.shape_cast %0 : vector<1x4x256xbf16> to vector<4x256xbf16>
    %2 = arith.extf %1 : vector<4x256xbf16> to vector<4x256xf32>
    %c0_2 = arith.constant 0 : index
    %c0_3 = arith.constant 0 : index
    %3 = vector.load %arg3[%c0_2, %c0_3] : memref<4x2xf32, #tpu.memory_space<vmem>>, vector<4x1xf32>
    %4 = vector.broadcast %3 : vector<4x1xf32> to vector<4x256xf32>
    %5 = arith.mulf %2, %4 : vector<4x256xf32>
    %c0_4 = arith.constant 0 : index
    %c1 = arith.constant 1 : index
    %6 = vector.load %arg3[%c0_4, %c1] : memref<4x2xf32, #tpu.memory_space<vmem>>, vector<4x1xf32>
    %7 = vector.broadcast %6 : vector<4x1xf32> to vector<4x256xf32>
    %8 = arith.addf %5, %7 : vector<4x256xf32>
    %cst = arith.constant 0.000000e+00 : f32
    %9 = vector.broadcast %cst : f32 to vector<4x256xf32>
    %10 = arith.maximumf %8, %9 : vector<4x256xf32>
    %cst_5 = arith.constant 0.000000e+00 : f32
    %11 = vector.broadcast %cst_5 : f32 to vector<4x290xf32>
    %c0_6 = arith.constant 0 : index
    %c0_7 = arith.constant 0 : index
    %12 = vector.load %arg6[%c0_6, %c0_7] : memref<4x290xf32, #tpu.memory_space<vmem>>, vector<4x290xf32>
    tpu.vector_store %arg6[%c0_6, %c0_7], %11 {strides = array<i32>} : memref<4x290xf32, #tpu.memory_space<vmem>>, vector<4x290xf32>,
    %c0_8 = arith.constant 0 : index
    %c17 = arith.constant 17 : index
    %13 = vector.load %arg6[%c0_8, %c17] : memref<4x290xf32, #tpu.memory_space<vmem>>, vector<4x256xf32>
    tpu.vector_store %arg6[%c0_8, %c17], %10 {strides = array<i32>} : memref<4x290xf32, #tpu.memory_space<vmem>>, vector<4x256xf32>,
    %14 = tpu.iota {dimensions = array<i32: 1>} : vector<1x256xi32>
    %c16_i32 = arith.constant 16 : i32
    %c0_i32 = arith.constant 0 : i32
    %15 = arith.cmpi eq, %c16_i32, %c0_i32 : i32
    %c1_i32 = arith.constant 1 : i32
    %16 = arith.select %15, %c1_i32, %c16_i32 : i32
    %17 = vector.broadcast %16 : i32 to vector<1x256xi32>
    %18 = arith.remsi %14, %17 : vector<1x256xi32>
    %c0_i32_9 = arith.constant 0 : i32
    %19 = vector.broadcast %c0_i32_9 : i32 to vector<1x256xi32>
    %20 = arith.cmpi ne, %18, %19 : vector<1x256xi32>
    %c0_i32_10 = arith.constant 0 : i32
    %21 = vector.broadcast %c0_i32_10 : i32 to vector<1x256xi32>
    %22 = arith.cmpi slt, %18, %21 : vector<1x256xi32>
    %c0_i32_11 = arith.constant 0 : i32
    %23 = arith.cmpi slt, %16, %c0_i32_11 : i32
    %24 = vector.broadcast %23 : i1 to vector<1x256xi1>
    %25 = vector.broadcast %24 : vector<1x256xi1> to vector<1x256xi1>
    %26 = arith.xori %22, %25 : vector<1x256xi1>
    %27 = arith.andi %26, %20 : vector<1x256xi1>
    %28 = vector.broadcast %16 : i32 to vector<1x256xi32>
    %29 = arith.addi %18, %28 : vector<1x256xi32>
    %30 = arith.select %27, %29, %18 : vector<1x256xi1>, vector<1x256xi32>
    %c1_i32_12 = arith.constant 1 : i32
    %31 = vector.broadcast %c1_i32_12 : i32 to vector<1x256xi32>
    %32 = arith.cmpi sge, %30, %31 : vector<1x256xi32>
    %c14_i32 = arith.constant 14 : i32
    %33 = vector.broadcast %c14_i32 : i32 to vector<1x256xi32>
    %34 = arith.cmpi sle, %30, %33 : vector<1x256xi32>
    %c0_13 = arith.constant 0 : index
    %c0_14 = arith.constant 0 : index
    %35 = vector.load %arg6[%c0_13, %c0_14] : memref<4x290xf32, #tpu.memory_space<vmem>>, vector<4x256xf32>
    %cst_15 = arith.constant 0.000000e+00 : f32
    %36 = vector.shape_cast %32 : vector<1x256xi1> to vector<1x256xi1>
    %37 = vector.broadcast %36 : vector<1x256xi1> to vector<4x256xi1>
    %38 = vector.broadcast %cst_15 : f32 to vector<4x256xf32>
    %39 = arith.select %37, %35, %38 : vector<4x256xi1>, vector<4x256xf32>
    %40 = arith.truncf %39 : vector<4x256xf32> to vector<4x256xbf16>
    %c0_16 = arith.constant 0 : index
    %c0_17 = arith.constant 0 : index
    %41 = vector.load %arg7[%c0_16, %c0_17] : memref<36x256xbf16, #tpu.memory_space<vmem>>, vector<4x256xbf16>
    tpu.vector_store %arg7[%c0_16, %c0_17], %40 {strides = array<i32>} : memref<36x256xbf16, #tpu.memory_space<vmem>>, vector<4x256xbf16>,
    %c0_18 = arith.constant 0 : index
    %c1_19 = arith.constant 1 : index
    %42 = vector.load %arg6[%c0_18, %c1_19] : memref<4x290xf32, #tpu.memory_space<vmem>>, vector<4x256xf32>
    %43 = arith.truncf %42 : vector<4x256xf32> to vector<4x256xbf16>
    %c4 = arith.constant 4 : index
    %c0_20 = arith.constant 0 : index
    %44 = vector.load %arg7[%c4, %c0_20] : memref<36x256xbf16, #tpu.memory_space<vmem>>, vector<4x256xbf16>
    tpu.vector_store %arg7[%c4, %c0_20], %43 {strides = array<i32>} : memref<36x256xbf16, #tpu.memory_space<vmem>>, vector<4x256xbf16>,
    %c0_21 = arith.constant 0 : index
    %c2 = arith.constant 2 : index
    %45 = vector.load %arg6[%c0_21, %c2] : memref<4x290xf32, #tpu.memory_space<vmem>>, vector<4x256xf32>
    %cst_22 = arith.constant 0.000000e+00 : f32
    %46 = vector.shape_cast %34 : vector<1x256xi1> to vector<1x256xi1>
    %47 = vector.broadcast %46 : vector<1x256xi1> to vector<4x256xi1>
    %48 = vector.broadcast %cst_22 : f32 to vector<4x256xf32>
    %49 = arith.select %47, %45, %48 : vector<4x256xi1>, vector<4x256xf32>
    %50 = arith.truncf %49 : vector<4x256xf32> to vector<4x256xbf16>
    %c8 = arith.constant 8 : index
    %c0_23 = arith.constant 0 : index
    %51 = vector.load %arg7[%c8, %c0_23] : memref<36x256xbf16, #tpu.memory_space<vmem>>, vector<4x256xbf16>
    tpu.vector_store %arg7[%c8, %c0_23], %50 {strides = array<i32>} : memref<36x256xbf16, #tpu.memory_space<vmem>>, vector<4x256xbf16>,
    %c0_24 = arith.constant 0 : index
    %c16 = arith.constant 16 : index
    %52 = vector.load %arg6[%c0_24, %c16] : memref<4x290xf32, #tpu.memory_space<vmem>>, vector<4x256xf32>
    %cst_25 = arith.constant 0.000000e+00 : f32
    %53 = vector.shape_cast %32 : vector<1x256xi1> to vector<1x256xi1>
    %54 = vector.broadcast %53 : vector<1x256xi1> to vector<4x256xi1>
    %55 = vector.broadcast %cst_25 : f32 to vector<4x256xf32>
    %56 = arith.select %54, %52, %55 : vector<4x256xi1>, vector<4x256xf32>
    %57 = arith.truncf %56 : vector<4x256xf32> to vector<4x256xbf16>
    %c12 = arith.constant 12 : index
    %c0_26 = arith.constant 0 : index
    %58 = vector.load %arg7[%c12, %c0_26] : memref<36x256xbf16, #tpu.memory_space<vmem>>, vector<4x256xbf16>
    tpu.vector_store %arg7[%c12, %c0_26], %57 {strides = array<i32>} : memref<36x256xbf16, #tpu.memory_space<vmem>>, vector<4x256xbf16>,
    %c0_27 = arith.constant 0 : index
    %c17_28 = arith.constant 17 : index
    %59 = vector.load %arg6[%c0_27, %c17_28] : memref<4x290xf32, #tpu.memory_space<vmem>>, vector<4x256xf32>
    %60 = arith.truncf %59 : vector<4x256xf32> to vector<4x256xbf16>
    %c16_29 = arith.constant 16 : index
    %c0_30 = arith.constant 0 : index
    %61 = vector.load %arg7[%c16_29, %c0_30] : memref<36x256xbf16, #tpu.memory_space<vmem>>, vector<4x256xbf16>
    tpu.vector_store %arg7[%c16_29, %c0_30], %60 {strides = array<i32>} : memref<36x256xbf16, #tpu.memory_space<vmem>>, vector<4x256xbf16>,
    %c0_31 = arith.constant 0 : index
    %c18 = arith.constant 18 : index
    %62 = vector.load %arg6[%c0_31, %c18] : memref<4x290xf32, #tpu.memory_space<vmem>>, vector<4x256xf32>
    %cst_32 = arith.constant 0.000000e+00 : f32
    %63 = vector.shape_cast %34 : vector<1x256xi1> to vector<1x256xi1>
    %64 = vector.broadcast %63 : vector<1x256xi1> to vector<4x256xi1>
    %65 = vector.broadcast %cst_32 : f32 to vector<4x256xf32>
    %66 = arith.select %64, %62, %65 : vector<4x256xi1>, vector<4x256xf32>
    %67 = arith.truncf %66 : vector<4x256xf32> to vector<4x256xbf16>
    %c20 = arith.constant 20 : index
    %c0_33 = arith.constant 0 : index
    %68 = vector.load %arg7[%c20, %c0_33] : memref<36x256xbf16, #tpu.memory_space<vmem>>, vector<4x256xbf16>
    tpu.vector_store %arg7[%c20, %c0_33], %67 {strides = array<i32>} : memref<36x256xbf16, #tpu.memory_space<vmem>>, vector<4x256xbf16>,
    %c0_34 = arith.constant 0 : index
    %c32 = arith.constant 32 : index
    %69 = vector.load %arg6[%c0_34, %c32] : memref<4x290xf32, #tpu.memory_space<vmem>>, vector<4x256xf32>
    %cst_35 = arith.constant 0.000000e+00 : f32
    %70 = vector.shape_cast %32 : vector<1x256xi1> to vector<1x256xi1>
    %71 = vector.broadcast %70 : vector<1x256xi1> to vector<4x256xi1>
    %72 = vector.broadcast %cst_35 : f32 to vector<4x256xf32>
    %73 = arith.select %71, %69, %72 : vector<4x256xi1>, vector<4x256xf32>
    %74 = arith.truncf %73 : vector<4x256xf32> to vector<4x256xbf16>
    %c24 = arith.constant 24 : index
    %c0_36 = arith.constant 0 : index
    %75 = vector.load %arg7[%c24, %c0_36] : memref<36x256xbf16, #tpu.memory_space<vmem>>, vector<4x256xbf16>
    tpu.vector_store %arg7[%c24, %c0_36], %74 {strides = array<i32>} : memref<36x256xbf16, #tpu.memory_space<vmem>>, vector<4x256xbf16>,
    %c0_37 = arith.constant 0 : index
    %c33 = arith.constant 33 : index
    %76 = vector.load %arg6[%c0_37, %c33] : memref<4x290xf32, #tpu.memory_space<vmem>>, vector<4x256xf32>
    %77 = arith.truncf %76 : vector<4x256xf32> to vector<4x256xbf16>
    %c28 = arith.constant 28 : index
    %c0_38 = arith.constant 0 : index
    %78 = vector.load %arg7[%c28, %c0_38] : memref<36x256xbf16, #tpu.memory_space<vmem>>, vector<4x256xbf16>
    tpu.vector_store %arg7[%c28, %c0_38], %77 {strides = array<i32>} : memref<36x256xbf16, #tpu.memory_space<vmem>>, vector<4x256xbf16>,
    %c0_39 = arith.constant 0 : index
    %c34 = arith.constant 34 : index
    %79 = vector.load %arg6[%c0_39, %c34] : memref<4x290xf32, #tpu.memory_space<vmem>>, vector<4x256xf32>
    %cst_40 = arith.constant 0.000000e+00 : f32
    %80 = vector.shape_cast %34 : vector<1x256xi1> to vector<1x256xi1>
    %81 = vector.broadcast %80 : vector<1x256xi1> to vector<4x256xi1>
    %82 = vector.broadcast %cst_40 : f32 to vector<4x256xf32>
    %83 = arith.select %81, %79, %82 : vector<4x256xi1>, vector<4x256xf32>
    %84 = arith.truncf %83 : vector<4x256xf32> to vector<4x256xbf16>
    %c32_41 = arith.constant 32 : index
    %c0_42 = arith.constant 0 : index
    %85 = vector.load %arg7[%c32_41, %c0_42] : memref<36x256xbf16, #tpu.memory_space<vmem>>, vector<4x256xbf16>
    tpu.vector_store %arg7[%c32_41, %c0_42], %84 {strides = array<i32>} : memref<36x256xbf16, #tpu.memory_space<vmem>>, vector<4x256xbf16>,
    %c0_43 = arith.constant 0 : index
    %c0_44 = arith.constant 0 : index
    %86 = vector.load %arg2[%c0_43, %c0_44] : memref<4x36xbf16, #tpu.memory_space<vmem>>, vector<4x36xbf16>
    %c0_45 = arith.constant 0 : index
    %c0_46 = arith.constant 0 : index
    %87 = vector.load %arg7[%c0_45, %c0_46] : memref<36x256xbf16, #tpu.memory_space<vmem>>, vector<36x256xbf16>
    %cst_47 = arith.constant dense<0.000000e+00> : vector<4x256xf32>
    %88 = tpu.matmul %86, %87, %cst_47 {dimension_numbers = #tpu.dot_dimension_numbers<[1], [0], [0], [1], [0, 0, 1, 1], [], []>} : vector<4x36xbf16>, vector<36x256xbf16>, vector<4x256xf32> -> vector<4x256xf32>
    %89 = vector.shape_cast %88 : vector<4x256xf32> to vector<1x4x256xf32>
    %90 = arith.truncf %89 : vector<1x4x256xf32> to vector<1x4x256xbf16>
    %c0_48 = arith.constant 0 : index
    %c0_49 = arith.constant 0 : index
    %c0_50 = arith.constant 0 : index
    %91 = vector.load %arg4[%c0_48, %c0_49, %c0_50] : memref<1x4x256xbf16, #tpu.memory_space<vmem>>, vector<1x4x256xbf16>
    tpu.vector_store %arg4[%c0_48, %c0_49, %c0_50], %90 {strides = array<i32>} : memref<1x4x256xbf16, #tpu.memory_space<vmem>>, vector<1x4x256xbf16>,
    %cst_51 = arith.constant dense<0.000000e+00> : vector<4xf32>
    %92 = vector.multi_reduction <add>, %88, %cst_51 [1] : vector<4x256xf32> to vector<4xf32>
    %93 = vector.shape_cast %92 : vector<4xf32> to vector<4x1xf32>
    %94 = vector.shape_cast %93 : vector<4x1xf32> to vector<1x4x1xf32>
    %c0_52 = arith.constant 0 : index
    %c0_53 = arith.constant 0 : index
    %c0_54 = arith.constant 0 : index
    %95 = vector.load %arg5[%c0_52, %c0_53, %c0_54] : memref<1x4x2xf32, #tpu.memory_space<vmem>>, vector<1x4x1xf32>
    tpu.vector_store %arg5[%c0_52, %c0_53, %c0_54], %94 {strides = array<i32>} : memref<1x4x2xf32, #tpu.memory_space<vmem>>, vector<1x4x1xf32>,
    %96 = arith.mulf %88, %88 : vector<4x256xf32>
    %cst_55 = arith.constant dense<0.000000e+00> : vector<4xf32>
    %97 = vector.multi_reduction <add>, %96, %cst_55 [1] : vector<4x256xf32> to vector<4xf32>
    %98 = vector.shape_cast %97 : vector<4xf32> to vector<4x1xf32>
    %99 = vector.shape_cast %98 : vector<4x1xf32> to vector<1x4x1xf32>
    %c0_56 = arith.constant 0 : index
    %c0_57 = arith.constant 0 : index
    %c1_58 = arith.constant 1 : index
    %100 = vector.load %arg5[%c0_56, %c0_57, %c1_58] : memref<1x4x2xf32, #tpu.memory_space<vmem>>, vector<1x4x1xf32>
    tpu.vector_store %arg5[%c0_56, %c0_57, %c1_58], %99 {strides = array<i32>} : memref<1x4x2xf32, #tpu.memory_space<vmem>>, vector<1x4x1xf32>,
    return
  }
  func.func @transform_0(%arg0: i32) -> (i32, i32, i32) {
    %c0_i32 = arith.constant 0 : i32
    %c0_i32_0 = arith.constant 0 : i32
    %c0_i32_1 = arith.constant 0 : i32
    return %arg0, %c0_i32, %c0_i32_0 : i32, i32, i32
  }
  func.func @transform_1(%arg0: i32) -> (i32, i32) {
    %c0_i32 = arith.constant 0 : i32
    %c0_i32_0 = arith.constant 0 : i32
    %c0_i32_1 = arith.constant 0 : i32
    return %c0_i32, %c0_i32_0 : i32, i32
  }
  func.func @transform_2(%arg0: i32) -> (i32, i32) {
    %c0_i32 = arith.constant 0 : i32
    %c0_i32_0 = arith.constant 0 : i32
    %c0_i32_1 = arith.constant 0 : i32
    return %c0_i32, %c0_i32_0 : i32, i32
  }
  func.func @transform_3(%arg0: i32) -> (i32, i32, i32) {
    %c0_i32 = arith.constant 0 : i32
    %c0_i32_0 = arith.constant 0 : i32
    %c0_i32_1 = arith.constant 0 : i32
    return %arg0, %c0_i32, %c0_i32_0 : i32, i32, i32
  }
  func.func @transform_4(%arg0: i32) -> (i32, i32, i32) {
    %c0_i32 = arith.constant 0 : i32
    %c0_i32_0 = arith.constant 0 : i32
    %c0_i32_1 = arith.constant 0 : i32
    return %arg0, %c0_i32, %c0_i32_0 : i32, i32, i32
  }
}

</mosaic_0001>

<bundles_post_ra>
// kernel: resblock_forward.4
= control target key start
LH: loop header
LB: loop body
LE: loop exit
PB: predicated region body
PF: predicated region fallthrough
CT: control target
= control target key end

     0   :  { %vm12_vm0 = vcmask 15360   ;;  %v37_v2 = vmov 0.0   ;;  %vm21_vm1 = vcmask 7168   ;;  %vm30_vm2 = vcmask 15368   ;;  %s69_s0 = inlined_call_operand.vmem [shape: f32[8,256], index: 0, kind: input, shape index: {}]   ;;  %s70_s1 = inlined_call_operand.vmem [shape: f32[8,2], index: 1, kind: output, shape index: {}]  }
   0x1   :  { %v14_v0 = vld [vmem:[%s69_s0] sm:$0xff]  ;;  %v15_v1 = vld [vmem:[%s69_s0 + $0x8] sm:$0xff]  ;;  %13 = vst.msk [vmem:[%s70_s1] sm:$0xff] %vm12_vm0, %v37_v2 }
   0x2   :  { %v17_v3 = vadd.f32 %v15_v1, %v14_v0  ;;  %v24_v4 = vmul.f32 %v14_v0, %v14_v0  ;;  %v25_v5 = vmul.f32 %v15_v1, %v15_v1 }
   0x4   :  { %18 = vadd.xlane.f32.xlu0 %v17_v3  ;;  %v26_v6 = vadd.f32 %v25_v5, %v24_v4 }
   0x8   :  { %v16_v7 = vld [vmem:[%s70_s1] sm:$0xff] }
   0xc   :  { %27 = vadd.xlane.f32.xlu0 %v26_v6 }
  0x77   :  { %v19_v8 = vpop.xlane.xlu0 %18 }
  0x78   :  { %v20_v9 = vadd.f32 %v19_v8, %v16_v7 }
  0x7a   :  { %22 = vst.msk [vmem:[%s70_s1] sm:$0xff] %vm21_vm1, %v20_v9 }
  0x7f   :  { %v28_v10 = vpop.xlane.xlu0 %27 }
  0x81   :  { %v23_v11 = vld [vmem:[%s70_s1] sm:$0xff] }
  0x82   :  { %v29_v12 = vadd.f32 %v28_v10, %v23_v11 }
  0x84   :  { %31 = vst.msk [vmem:[%s70_s1] sm:$0xff] %vm30_vm2, %v29_v12 }

// kernel: resblock_forward.7
= control target key start
LH: loop header
LB: loop body
LE: loop exit
PB: predicated region body
PF: predicated region fallthrough
CT: control target
= control target key end

     0   :  { %s468_s12 = smov 0   ;;  %s470_s13 = smov 0   ;;  %s507_s0 = inlined_call_operand.vmem [shape: bf16[2,4,256], index: 0, kind: input, shape index: {}]   ;;  %s508_s1 = inlined_call_operand.vmem [shape: f32[2,4,256], index: 1, kind: input, shape index: {}]   ;;  %s509_s2 = inlined_call_operand.vmem [shape: f32[4,2], index: 2, kind: input, shape index: {}]   ;;  %s510_s3 = inlined_call_operand.vmem [shape: f32[2,4,256], index: 3, kind: output, shape index: {}]  }
   0x1   :  { %s472_s14 = smov 0  }
   0x2 LB: > { %s25_s15 = sadd.s32 1, %s439_s13  ;;  %p380_p0 = scmp.ge.s32.totalorder %s443_s14, 1  ;;  %s443_s14 = sphi %s472_s14, %s13_s14   ;;  %s439_s13 = sphi %s470_s13, %s512_s13   ;;  %s435_s12 = sphi %s468_s12, %s511_s12  }
   0x3   : > { %p27_p1 = scmp.ge.s32.totalorder %s25_s15, 2  ;;  %p175_p2 = scmp.lt.s32.totalorder %s443_s14, 3 }
   0x5   : > { %s514_s15 = smov (%p27_p1, %s25_s15), 0  ;;  %p176_p3 = pnand %p380_p0, %p175_p2 }
   0x6   : > { %p217_p4 = scmp.lt.s32.totalorder (!%p176_p3), %s435_s12, 1 }
   0x7   : > { %179 = sbr.rel (%p176_p3) target bundleno = 143 (0x8f), region = 32 }
   0xc   : > { %v249_v0 = vld [vmem:[%s509_s2] sm:$0xf]  ;;  %v445_v1 = vmov 0   ;;  %v446_v2 = vmov 1   ;;  %s516_s12 = smov (!%p217_p4, %s435_s12), 1 }
   0xd   : > { %419 = vset.pattern.permute.xlu0 %v445_v1  ;;  %s389_s18 = sshll.u32 %s516_s12, 2  ;;  %v447_v3 = vmov 839922192   ;;  %s390_s22 = sshll.u32 %s516_s12, 3 }
   0xe   : > { %252 = vperm.xlu0 %419, %v249_v0   ;;  %v255_v4 = vunpack.c.l.s4 %v447_v3  ;;  %s224_s21 = scalar_lea.vmem %s507_s0, %s389_s18  ;;  %s234_s25 = scalar_lea.vmem %s508_s1, %s390_s22 }
   0xf   : > { %v246_v6 = vld [vmem:[%s224_s21] sm:$0xf]  ;;  %s244_s28 = scalar_lea.vmem %s510_s3, %s390_s22 }
  0x10   : > { %v256_v5 = vunpack.c.0.s8 %v255_v4  ;;  %v247_v8 = vunpack.c.l.bf16 %v246_v6  ;;  %v248_v11 = vld [vmem:[%s234_s25] sm:$0xff] }
  0x16   : > { %420 = vset.pattern.permute.xlu0 %v446_v2 }
  0x17   : > { %262 = vperm.xlu0 %420, %v249_v0  }
  0x80   : > { %v253_v7 = vpop.permute.xlu0 %252 }
  0x81   : > { %v257_v9 = vperm.slane %v253_v7, %v256_v5 }
  0x83   : > { %v259_v10 = vmul.f32 %v257_v9, %v247_v8 }
  0x85   : > { %v260_v13 = vadd.f32 %v259_v10, %v248_v11 }
  0x89   : > { %v263_v12 = vpop.permute.xlu0 %262 }
  0x8a   : > { %v267_v14 = vperm.slane %v263_v12, %v256_v5 }
  0x8c   : > { %v269_v15 = vadd.f32 %v267_v14, %v260_v13 }
  0x8e   : > { %270 = vst [vmem:[%s244_s28] sm:$0xff] %v269_v15 }
  0x8f PF: > { %s13_s14 = sadd.s32 1, %s443_s14   ;;  %s511_s12 = smov %s439_s13 }
  0x90   : > { %p10_p5 = scmp.ge.s32.totalorder %s13_s14, 4   ;;  %s512_s13 = smov %s514_s15 }
  0x92   :  { %12 = sbr.rel (!%p10_p5) target bundleno = 2 (0x2), region = 65 }

// kernel: resblock_forward.5
= control target key start
LH: loop header
LB: loop body
LE: loop exit
PB: predicated region body
PF: predicated region fallthrough
CT: control target
= control target key end

     0   :  { %s827_s15 = smov 0   ;;  %s954_s0 = inlined_call_operand.vmem [shape: f32[2,4,256], index: 0, kind: input, shape index: {}]   ;;  %s955_s1 = inlined_call_operand.vmem [shape: bf16[4,36], index: 1, kind: input, shape index: {}]   ;;  %s956_s2 = inlined_call_operand.vmem [shape: f32[4,2], index: 2, kind: input, shape index: {}]   ;;  %s957_s3 = inlined_call_operand.vmem [shape: bf16[2,4,256], index: 3, kind: output, shape index: {0}]   ;;  %s958_s4 = inlined_call_operand.vmem [shape: f32[2,4,2], index: 4, kind: output, shape index: {1}]  }
   0x1 LB: > { %s697_s16 = sadd.s32 4294967295, %s787_s15   ;;  %p701_p0 = scmp.ge.s32.totalorder %s787_s15, 1  ;;  %s787_s15 = sphi %s827_s15, %s15_s15  }
   0x2   : > { %p165_p1 = scmp.lt.s32.totalorder %s787_s15, 3 }
   0x4   : > { %p166_p2 = pnand %p701_p0, %p165_p1 }
   0x5   : > { %p195_p3 = scmp.lt.s32.totalorder (!%p166_p2), %s697_s16, 1  ;;  %s793_s23 = smov (!%p166_p2), 17  }
   0x6   : > { %169 = sbr.rel (%p166_p2) target bundleno = 737 (0x2e1), region = 32  ;;  %s794_s24 = smov (!%p166_p2), 111  }
   0x7   : > { %s795_s25 = smov (!%p166_p2), 110   ;;  %s796_s26 = smov (!%p166_p2), 112  }
   0x8   : > { %s797_s27 = smov (!%p166_p2), 96   ;;  %s798_s28 = smov (!%p166_p2), 95  }
   0x9   : > { %s799_s29 = smov (!%p166_p2), 94   ;;  %s800_s30 = smov (!%p166_p2), 126  }
   0xa   : > { %s801_s5 = smov (!%p166_p2), 127  }
   0xb   : > { %v211_v0 = vld [vmem:[%s956_s2] sm:$0xf]  ;;  %v789_v1 = vmov 0   ;;  %v790_v2 = vmov 1   ;;  %vm232_vm0 = vcmask 273408   ;;  %v791_v3 = vmov 0.0  }
   0xc   : > { %754 = vset.pattern.permute.xlu0 %v789_v1  ;;  %231 = vst [vmem:[#allocation2] sm:$0xff] %v791_v3  ;;  %s968_s16 = smov (!%p195_p3, %s697_s16), 1  ;;  %v792_v4 = vmov 839922192   ;;  %vm242_vm1 = vcmask 1043592   ;;  %vm243_vm2 = vcmask 1047556   ;;  %v248_v16 = vlaneseq }
   0xd   : > { %214 = vperm.xlu0 %754, %v211_v0   ;;  %233 = vst.msk [vmem:[#allocation2 + $0x8] sm:$0xf] %vm232_vm0, %v791_v3  ;;  %v217_v5 = vunpack.c.l.s4 %v792_v4  ;;  %s727_s19 = sshll.u32 %s968_s16, 3  ;;  %vm238_vm3 = vcmask 138240   ;;  %vm246_vm4 = vcmask 134144   ;;  %vm244_vm5 = vmor %vm243_vm2, %vm242_vm1  ;;  %vm319_vm8 = vcmask 1043456  }
   0xe   : > { %s199_s22 = scalar_lea.vmem %s954_s0, %s727_s19  ;;  %v844_v18 = vand.u32 127, %v248_v16  ;;  %vm406_vm9 = vcmask 908288   ;;  %vm426_vm10 = vcmask 900096   ;;  %vm370_vm13 = vcmask 916480   ;;  %s728_s8 = sshll.u32 %s968_s16, 2 }
   0xf   : > { %v218_v7 = vunpack.c.0.s8 %v217_v5  ;;  %v210_v9 = vld [vmem:[%s199_s22] sm:$0xff]  ;;  %vm454_vm14 = vcmask 785408   ;;  %vm489_vm15 = vcmask 777216   ;;  %vm509_vm0 = vcmask 769024   ;;  %s204_s11 = scalar_lea.vmem %s957_s3, %s728_s8  ;;  %s208_s14 = scalar_lea.vmem %s958_s4, %s728_s8 }
  0x10   : > { %v847_v19 = vadd.s32 128, %v844_v18  ;;  %v255_v22 = vand.u32 15, %v844_v18  ;;  %vm321_vm1 = vcmask 1039360   ;;  %vm345_vm2 = vcmask 1031168  }
  0x12   : > { %v262_v23 = vand.u32 15, %v847_v19  ;;  %vm862_vm7 = vcmp.ge.s32.totalorder %v255_v22, 1  ;;  %vm902_vm11 = vcmp.le.s32.totalorder %v255_v22, 14 }
  0x14   : > { %vm856_vm6 = vcmp.ge.s32.totalorder %v262_v23, 1  ;;  %vm908_vm12 = vcmp.le.s32.totalorder %v262_v23, 14 }
  0x15   : > { %755 = vset.pattern.permute.xlu0 %v790_v2 }
  0x16   : > { %223 = vperm.xlu0 %755, %v211_v0  }
  0x7f   : > { %v215_v6 = vpop.permute.xlu0 %214 }
  0x80   : > { %v219_v8 = vperm.slane %v215_v6, %v218_v7 }
  0x82   : > { %v221_v11 = vmul.f32 %v219_v8, %v210_v9 }
  0x88   : > { %v224_v10 = vpop.permute.xlu0 %223 }
  0x89   : > { %v228_v12 = vperm.slane %v224_v10, %v218_v7 }
  0x8b   : > { %v230_v13 = vadd.f32 %v228_v12, %v221_v11 }
  0x8d   : > { %235 = vrot.lane.b32.xlu1 %v230_v13, %s793_s23 }
  0xff   : > { %v236_v14 = vpop.permute.xlu1 %235 }
 0x100   : > { %v237_v15 = vrot.slane %v236_v14, 4 }
 0x102   : > { %v239_v17 = vsel %vm238_vm3, %v237_v15, %v236_v14  ;;  %247 = vst.msk [vmem:[#allocation2 + $0x8] sm:$0xf] %vm246_vm4, %v237_v15  ;;  %vm553_vm3 = vcmask 1041408   ;;  %vm549_vm4 = vcmask 293888  }
 0x103   : > { %245 = vst.msk [vmem:[#allocation2] sm:$0xff] %vm244_vm5, %v239_v17  ;;  %vm600_vm5 = vcmask 3072  }
 0x109   : > { %v295_v20 = vld [vmem:[#allocation2 + $0x8] sm:$0xf] }
 0x10a   : > { %v849_v21 = vld [vmem:[#allocation2] sm:$0xff]  ;;  %300 = vst [vmem:[#allocation1 + $0x10] ss:$2 sm:$0xff] %v295_v20  ;;  %v326_v29 = vld [vmem:[#allocation2 + $0x8] sm:$0xf] }
 0x10b   : > { %285 = vst [vmem:[#allocation1] ss:$2 sm:$0xff] %v849_v21  ;;  %v355_v33 = vld [vmem:[#allocation2 + $0x8] sm:$0xf] }
 0x10c   : > { %v383_v37 = vld [vmem:[#allocation2 + $0x8] sm:$0xf] }
 0x10d   : > { %v411_v41 = vld [vmem:[#allocation2 + $0x8] sm:$0xf] }
 0x10e   : > { %v439_v46 = vld [vmem:[#allocation2 + $0x8] sm:$0xf] }
 0x10f   : > { %v464_v51 = vld [vmem:[#allocation2 + $0x8] sm:$0xf] }
 0x110   : > { %v494_v55 = vld [vmem:[#allocation2 + $0x8] sm:$0xf] }
 0x111   : > { %v866_v26 = vld.sshfl [vmem:[#allocation1 + $0x10] sm:$0xff pattern:$0x75316420] }
 0x112   : > { %v286_v27 = vld.sshfl [vmem:[#allocation1] sm:$0xff pattern:$0x75316420]  ;;  %v287_v28 = vld.sshfl [vmem:[#allocation1 + $0x8] sm:$0xff pattern:$0x75316420]  ;;  %v308_v9 = vpack.c.bf16 %v866_v26, %v866_v26 }
 0x113   : > { %298 = vst [vmem:[#allocation1] ss:$2 sm:$0xff] %v849_v21  ;;  %v291_v30 = vsel %vm856_vm6, %v287_v28, 0.0  ;;  %v290_v31 = vsel %vm862_vm7, %v286_v27, 0.0 }
 0x114   : > { %335 = vst [vmem:[#allocation1 + $0x10] ss:$2 sm:$0xff] %v326_v29  ;;  %v292_v32 = vpack.c.bf16 %v291_v30, %v290_v31  ;;  %v312_v11 = vrot.slane %v308_v9, 6 }
 0x116   : > { %293 = vst [vmem:[#allocation3] sm:$0x33] %v292_v32 }
 0x11a   : > { %v873_v34 = vld.sshfl [vmem:[#allocation1] sm:$0xff pattern:$0x75316420]  ;;  %v875_v35 = vld.sshfl [vmem:[#allocation1 + $0x8] sm:$0xff pattern:$0x75316420] }
 0x11b   : > { %333 = vst [vmem:[#allocation1] ss:$2 sm:$0xff] %v849_v21  ;;  %v878_v36 = vld.sshfl [vmem:[#allocation1 + $0x10] sm:$0xff pattern:$0x75316420]  ;;  %v307_v10 = vpack.c.bf16 %v875_v35, %v873_v34 }
 0x11c   : > { %360 = vst [vmem:[#allocation1 + $0x10] ss:$2 sm:$0xff] %v355_v33 }
 0x11d   : > { %v311_v12 = vrot.slane %v307_v10, 6 }
 0x122   : > { %v880_v38 = vld.sshfl [vmem:[#allocation1] sm:$0xff pattern:$0x75316420]  ;;  %v882_v39 = vld.sshfl [vmem:[#allocation1 + $0x8] sm:$0xff pattern:$0x75316420] }
 0x123   : > { %358 = vst [vmem:[#allocation1] ss:$2 sm:$0xff] %v849_v21  ;;  %v363_v40 = vld.sshfl [vmem:[#allocation1 + $0x10] sm:$0xff pattern:$0x75316420]  ;;  %v776_v8 = vpack.i.bf16 %v882_v39, %v880_v38 }
 0x124   : > { %388 = vst [vmem:[#allocation1 + $0x10] ss:$2 sm:$0xff] %v383_v37 }
 0x12a   : > { %v361_v42 = vld.sshfl [vmem:[#allocation1] sm:$0xff pattern:$0x75316420]  ;;  %v362_v43 = vld.sshfl [vmem:[#allocation1 + $0x8] sm:$0xff pattern:$0x75316420] }
 0x12b   : > { %v391_v44 = vld.sshfl [vmem:[#allocation1 + $0x10] sm:$0xff pattern:$0x75316420]  ;;  %386 = vst [vmem:[#allocation1] ss:$2 sm:$0xff] %v849_v21  ;;  %v766_v7 = vpack.i.bf16 %v362_v43, %v361_v42 }
 0x12c   : > { %v396_v45 = vpack.c.bf16 %v391_v44, %v391_v44  ;;  %416 = vst [vmem:[#allocation1 + $0x10] ss:$2 sm:$0xff] %v411_v41 }
 0x12e   : > { %401 = vrot.lane.b32.xlu0 %v396_v45, %s794_s24 }
 0x132   : > { %v389_v47 = vld.sshfl [vmem:[#allocation1] sm:$0xff pattern:$0x75316420]  ;;  %v390_v48 = vld.sshfl [vmem:[#allocation1 + $0x8] sm:$0xff pattern:$0x75316420] }
 0x133   : > { %v419_v49 = vld.sshfl [vmem:[#allocation1 + $0x10] sm:$0xff pattern:$0x75316420]  ;;  %v395_v50 = vpack.c.bf16 %v390_v48, %v389_v47  ;;  %414 = vst [vmem:[#allocation1] ss:$2 sm:$0xff] %v849_v21 }
 0x134   : > { %424 = vrot.lane.b32.xlu1 %v419_v49, %s795_s25  ;;  %444 = vst [vmem:[#allocation1 + $0x10] ss:$2 sm:$0xff] %v439_v46 }
 0x135   : > { %399 = vrot.lane.b32.xlu2 %v395_v50, %s794_s24 }
 0x136   : > { %368 = vrot.lane.b32.xlu0 %v363_v40, %s796_s26 }
 0x13a   : > { %v417_v52 = vld.sshfl [vmem:[#allocation1] sm:$0xff pattern:$0x75316420]  ;;  %v418_v53 = vld.sshfl [vmem:[#allocation1 + $0x8] sm:$0xff pattern:$0x75316420] }
 0x13b   : > { %442 = vst [vmem:[#allocation1] ss:$2 sm:$0xff] %v849_v21  ;;  %v447_v54 = vld.sshfl [vmem:[#allocation1 + $0x10] sm:$0xff pattern:$0x75316420]  ;;  %v756_v59 = vpack.i.bf16 %v418_v53, %v417_v52 }
 0x13c   : > { %469 = vst [vmem:[#allocation1 + $0x10] ss:$2 sm:$0xff] %v464_v51 }
 0x13d   : > { %452 = vrot.lane.b32.xlu2 %v447_v54, %s797_s27 }
 0x142   : > { %v445_v56 = vld.sshfl [vmem:[#allocation1] sm:$0xff pattern:$0x75316420]  ;;  %v446_v57 = vld.sshfl [vmem:[#allocation1 + $0x8] sm:$0xff pattern:$0x75316420] }
 0x143   : > { %v761_v58 = vpack.i.bf16 %v446_v57, %v445_v56  ;;  %467 = vst [vmem:[#allocation1] ss:$2 sm:$0xff] %v849_v21  ;;  %v472_v60 = vld.sshfl [vmem:[#allocation1 + $0x10] sm:$0xff pattern:$0x75316420] }
 0x144   : > { %499 = vst [vmem:[#allocation1 + $0x10] ss:$2 sm:$0xff] %v494_v55  ;;  %v477_v61 = vpack.c.bf16 %v472_v60, %v472_v60 }
 0x145   : > { %762 = vrot.lane.b32.xlu1 %v761_v58, %s797_s27  ;;  %757 = vrot.lane.b32.xlu2 %v756_v59, %s795_s25 }
 0x146   : > { %v481_v0 = vrot.slane %v477_v61, 6 }
 0x14a   : > { %v470_v62 = vld.sshfl [vmem:[#allocation1] sm:$0xff pattern:$0x75316420]  ;;  %v471_v63 = vld.sshfl [vmem:[#allocation1 + $0x8] sm:$0xff pattern:$0x75316420] }
 0x14b   : > { %v476_v1 = vpack.c.bf16 %v471_v63, %v470_v62  ;;  %497 = vst [vmem:[#allocation1] ss:$2 sm:$0xff] %v849_v21  ;;  %v502_v2 = vld.sshfl [vmem:[#allocation1 + $0x10] sm:$0xff pattern:$0x75316420] }
 0x14d   : > { %484 = vrot.lane.b32.xlu1 %v481_v0, %s798_s28  ;;  %507 = vrot.lane.b32.xlu2 %v502_v2, %s799_s29  ;;  %v480_v3 = vrot.slane %v476_v1, 6 }
 0x14f   : > { %482 = vrot.lane.b32.xlu0 %v480_v3, %s798_s28 }
 0x152   : > { %v500_v4 = vld.sshfl [vmem:[#allocation1] sm:$0xff pattern:$0x75316420]  ;;  %v501_v5 = vld.sshfl [vmem:[#allocation1 + $0x8] sm:$0xff pattern:$0x75316420] }
 0x153   : > { %v771_v6 = vpack.i.bf16 %v501_v5, %v500_v4 }
 0x155   : > { %772 = vrot.lane.b32.xlu1 %v771_v6, %s799_s29  ;;  %767 = vrot.lane.b32.xlu2 %v766_v7, %s796_s26 }
 0x157   : > { %777 = vrot.lane.b32.xlu0 %v776_v8, %s800_s30 }
 0x15d   : > { %315 = vrot.lane.b32.xlu2 %v312_v11, %s801_s5  ;;  %313 = vrot.lane.b32.xlu1 %v311_v12, %s801_s5 }
 0x165   : > { %343 = vrot.lane.b32.xlu1 %v878_v36, %s800_s30 }
 0x18f   : > { %v400_v13 = vpop.permute.xlu2 %399 }
 0x190   : > { %v403_v17 = vrot.slane %v400_v13, 4 }
 0x197   : > { %v453_v14 = vpop.permute.xlu2 %452 }
 0x19f   : > { %v758_v15 = vpop.permute.xlu2 %757 }
 0x1a0   : > { %v402_v16 = vpop.permute.xlu0 %401  ;;  %v760_v21 = vunpack.i.h.bf16 %v758_v15  ;;  %v759_v26 = vunpack.i.l.bf16 %v758_v15 }
 0x1a1   : > { %v404_v20 = vrot.slane %v402_v16, 4 }
 0x1a2   : > { %v427_v31 = vsel %vm426_vm10, %v759_v26, %v760_v21 }
 0x1a3   : > { %v405_v27 = vsel %vm319_vm8, %v403_v17, %v404_v20  ;;  %v431_v35 = vsel %vm902_vm11, %v427_v31, 0.0 }
 0x1a4   : > { %v407_v28 = vsel %vm406_vm9, %v400_v13, %v405_v27 }
 0x1a5   : > { %409 = vst [vmem:[#allocation3 + $0x10] sm:$0x33] %v407_v28 }
 0x1a6   : > { %v425_v32 = vpop.permute.xlu1 %424 }
 0x1a7   : > { %v428_v33 = vsel %vm426_vm10, %v760_v21, %v425_v32  ;;  %v508_v34 = vpop.permute.xlu2 %507 }
 0x1a8   : > { %v432_v18 = vsel %vm908_vm12, %v428_v33, 0.0  ;;  %v369_v38 = vpop.permute.xlu0 %368 }
 0x1a9   : > { %v433_v22 = vpack.c.bf16 %v432_v18, %v431_v35 }
 0x1ab   : > { %v435_v36 = vrot.slane %v433_v22, 6 }
 0x1ad   : > { %437 = vst [vmem:[#allocation3 + $0x10] sm:$0xcc] %v435_v36 }
 0x1af   : > { %v768_v37 = vpop.permute.xlu2 %767 }
 0x1b0   : > { %v770_v19 = vunpack.i.h.bf16 %v768_v37  ;;  %v769_v23 = vunpack.i.l.bf16 %v768_v37 }
 0x1b2   : > { %v372_v39 = vsel %vm370_vm13, %v770_v19, %v369_v38  ;;  %v371_v40 = vsel %vm370_vm13, %v769_v23, %v770_v19  ;;  %v518_v23 = vld [vmem:[%s955_s1] sm:$0x3] }
 0x1b3   : > { %v376_v41 = vsel %vm856_vm6, %v372_v39, 0.0  ;;  %v375_v42 = vsel %vm862_vm7, %v371_v40, 0.0 }
 0x1b4   : > { %v377_v43 = vpack.c.bf16 %v376_v41, %v375_v42  ;;  %v717_v33 = vld [vmem:[#allocation3 + $0x10] sm:$0xf] }
 0x1b6   : > { %v379_v44 = vrot.slane %v377_v43, 6 }
 0x1b7   : > { %v763_v45 = vpop.permute.xlu1 %762  ;;  %v316_v1 = vpop.permute.xlu2 %315 }
 0x1b8   : > { %381 = vst [vmem:[#allocation3 + $0x8] sm:$0xcc] %v379_v44  ;;  %v765_v46 = vunpack.i.h.bf16 %v763_v45  ;;  %v764_v47 = vunpack.i.l.bf16 %v763_v45  ;;  %v318_v4 = vrot.slane %v316_v1, 4 }
 0x1ba   : > { %v455_v48 = vsel %vm454_vm14, %v764_v47, %v765_v46  ;;  %v456_v49 = vsel %vm454_vm14, %v765_v46, %v453_v14 }
 0x1bb   : > { %v459_v50 = vsel %vm862_vm7, %v455_v48, 0.0  ;;  %v460_v51 = vsel %vm856_vm6, %v456_v49, 0.0  ;;  %vm609_vm6 = vcmask 11272  }
 0x1bc   : > { %v461_v52 = vpack.c.bf16 %v460_v51, %v459_v50 }
 0x1be   : > { %462 = vst [vmem:[#allocation3 + $0x18] sm:$0x33] %v461_v52 }
 0x1bf   : > { %v485_v53 = vpop.permute.xlu1 %484 }
 0x1c0   : > { %v487_v55 = vrot.slane %v485_v53, 4 }
 0x1c1   : > { %v483_v54 = vpop.permute.xlu0 %482 }
 0x1c2   : > { %v486_v56 = vrot.slane %v483_v54, 4 }
 0x1c4   : > { %v488_v57 = vsel %vm319_vm8, %v486_v56, %v487_v55 }
 0x1c5   : > { %v490_v58 = vsel %vm489_vm15, %v483_v54, %v488_v57 }
 0x1c6   : > { %492 = vst [vmem:[#allocation3 + $0x18] sm:$0xcc] %v490_v58 }
 0x1c7   : > { %v773_v59 = vpop.permute.xlu1 %772 }
 0x1c8   : > { %v775_v60 = vunpack.i.h.bf16 %v773_v59  ;;  %v774_v61 = vunpack.i.l.bf16 %v773_v59 }
 0x1c9   : > { %v778_v2 = vpop.permute.xlu0 %777 }
 0x1ca   : > { %v510_v25 = vsel %vm509_vm0, %v774_v61, %v775_v60  ;;  %v511_v62 = vsel %vm509_vm0, %v775_v60, %v508_v34  ;;  %v780_v6 = vunpack.i.h.bf16 %v778_v2  ;;  %v779_v7 = vunpack.i.l.bf16 %v778_v2  ;;  %v731_v34 = vld [vmem:[#allocation3 + $0x14] sm:$0xf] }
 0x1cb   : > { %v514_v24 = vsel %vm902_vm11, %v510_v25, 0.0  ;;  %v515_v63 = vsel %vm908_vm12, %v511_v62, 0.0 }
 0x1cc   : > { %v516_v0 = vpack.c.bf16 %v515_v63, %v514_v24  ;;  %v346_v11 = vsel %vm345_vm2, %v779_v7, %v780_v6 }
 0x1cd   : > { %v350_v20 = vsel %vm902_vm11, %v346_v11, 0.0  ;;  %v732_v31 = vld [vmem:[#allocation3 + $0x14] sm:$0xf0]  ;;  %v719_v32 = vld [vmem:[#allocation3 + $0x18] sm:$0xf0] }
 0x1ce   : > { %517 = vst [vmem:[#allocation3 + $0x20] sm:$0x33] %v516_v0  ;;  %v718_v35 = vor.u32 %v732_v31, %v717_v33  ;;  %v722_v18 = vor.u32 %v731_v34, %v719_v32 }
 0x1cf   : > { %v314_v3 = vpop.permute.xlu1 %313 }
 0x1d0   : > { %v317_v5 = vrot.slane %v314_v3, 4 }
 0x1d2   : > { %v320_v8 = vsel %vm319_vm8, %v317_v5, %v318_v4 }
 0x1d3   : > { %v322_v9 = vsel %vm321_vm1, %v314_v3, %v320_v8 }
 0x1d4   : > { %324 = vst [vmem:[#allocation3] sm:$0xcc] %v322_v9 }
 0x1d5   : > { %v523_v10 = vld [vmem:[#allocation3 + $0x20] sm:$0x33] }
 0x1d6   : > { %v537_v12 = vunpack.c.l.b16 %v523_v10  ;;  %v538_v13 = vunpack.c.h.b16 %v523_v10 }
 0x1d7   : > { %v344_v14 = vpop.permute.xlu1 %343 }
 0x1d8   : > { %v347_v15 = vsel %vm345_vm2, %v780_v6, %v344_v14  ;;  %v543_v16 = vpack.c.b16 %v537_v12, %v537_v12  ;;  %v544_v17 = vpack.c.b16 %v538_v13, %v538_v13 }
 0x1d9   : > { %v351_v21 = vsel %vm908_vm12, %v347_v15, 0.0 }
 0x1da   : > { %v352_v26 = vpack.c.bf16 %v351_v21, %v350_v20  ;;  %v555_v27 = vsel %vm553_vm3, %v543_v16, 0  ;;  %v558_v28 = vsel %vm553_vm3, %v544_v17, 0 }
 0x1db   : > { %565 = vmatpush.bf16.msra.mxu0 %v555_v27  ;;  %578 = vmatpush.bf16.msra.mxu1 %v558_v28  ;;  %v709_v29 = vld [vmem:[#allocation3] sm:$0xf]  ;;  %v729_v22 = vld [vmem:[#allocation3 + $0x4] sm:$0xf] }
 0x1dc   : > { %353 = vst [vmem:[#allocation3 + $0x8] sm:$0x33] %v352_v26 }
 0x1df   : > { %566 = vmatpush.bf16.msra.mxu0 %v718_v35  ;;  %579 = vmatpush.bf16.msra.mxu1 %v722_v18 }
 0x1e3   : > { %v730_v30 = vld [vmem:[#allocation3 + $0x4] sm:$0xf0]  ;;  %v711_v36 = vld [vmem:[#allocation3 + $0x8] sm:$0xf0] }
 0x1e4   : > { %v710_v37 = vor.u32 %v730_v30, %v709_v29  ;;  %v714_v19 = vor.u32 %v729_v22, %v711_v36 }
 0x1e6   : > { %567 = vmatpush.bf16.msra.mxu0 %v710_v37  ;;  %580 = vmatpush.bf16.msra.mxu1 %v714_v19 }
 0x1e9   : > { %723 = vmatmul.msk.bf16.vlgmr.msra.gmra.mxu0 %vm549_vm4, %v518_v23  ;;  %724 = vmatmul.msk.bf16.vlgmr.msra.gmra.mxu1 %vm549_vm4, %v518_v23 }
 0x266   : > { %v569_v38 = vpop.f32.mrf.mxu0  ;;  %v582_v39 = vpop.f32.mrf.mxu1 }
 0x267   : > { %v602_v40 = vmul.f32 %v569_v38, %v569_v38  ;;  %v586_v41 = vpack.c.bf16 %v582_v39, %v569_v38  ;;  %v603_v42 = vmul.f32 %v582_v39, %v582_v39  ;;  %v595_v43 = vsel %vm319_vm8, %v569_v38, 0.0 }
 0x268   : > { %v596_v44 = vsel %vm319_vm8, %v582_v39, 0.0 }
 0x269   : > { %v588_v45 = vrot.slane %v586_v41, 2  ;;  %v597_v46 = vadd.f32 %v596_v44, %v595_v43  ;;  %v604_v47 = vsel %vm319_vm8, %v602_v40, 0.0  ;;  %v605_v48 = vsel %vm319_vm8, %v603_v42, 0.0 }
 0x26a   : > { %v606_v49 = vadd.f32 %v605_v48, %v604_v47 }
 0x26b   : > { %598 = vadd.xlane.f32.xlu2 %v597_v46  ;;  %v591_v50 = vsel %vm553_vm3, %v586_v41, %v588_v45 }
 0x26c   : > { %607 = vadd.xlane.f32.xlu0 %v606_v49  ;;  %593 = vst [vmem:[%s204_s11] sm:$0xf] %v591_v50 }
 0x26e   : > { %v571_v51 = vpop.f32.mrf.mxu0  ;;  %v584_v52 = vpop.f32.mrf.mxu1 }
 0x2de   : > { %v599_v53 = vpop.xlane.xlu2 %598 }
 0x2df   : > { %601 = vst.msk [vmem:[%s208_s14] sm:$0xf] %vm600_vm5, %v599_v53  ;;  %v608_v54 = vpop.xlane.xlu0 %607 }
 0x2e0   : > { %610 = vst.msk [vmem:[%s208_s14] sm:$0xf] %vm609_vm6, %v608_v54 }
 0x2e1 PF: > { %s15_s15 = sadd.s32 1, %s787_s15  }
 0x2e2   : > { %p12_p4 = scmp.ge.s32.totalorder %s15_s15, 4  }
 0x2e4   :  { %14 = sbr.rel (!%p12_p4) target bundleno = 1 (0x1), region = 82 }

// kernel: resblock_forward.6
= control target key start
LH: loop header
LB: loop body
LE: loop exit
PB: predicated region body
PF: predicated region fallthrough
CT: control target
= control target key end

     0   :  { %s829_s15 = smov 0   ;;  %s957_s0 = inlined_call_operand.vmem [shape: bf16[2,4,256], index: 0, kind: input, shape index: {}]   ;;  %s958_s1 = inlined_call_operand.vmem [shape: bf16[4,36], index: 1, kind: input, shape index: {}]   ;;  %s959_s2 = inlined_call_operand.vmem [shape: f32[4,2], index: 2, kind: input, shape index: {}]   ;;  %s960_s3 = inlined_call_operand.vmem [shape: bf16[2,4,256], index: 3, kind: output, shape index: {0}]   ;;  %s961_s4 = inlined_call_operand.vmem [shape: f32[2,4,2], index: 4, kind: output, shape index: {1}]  }
   0x1 LB: > { %s699_s16 = sadd.s32 4294967295, %s789_s15   ;;  %p703_p0 = scmp.ge.s32.totalorder %s789_s15, 1  ;;  %s789_s15 = sphi %s829_s15, %s15_s15  }
   0x2   : > { %p165_p1 = scmp.lt.s32.totalorder %s789_s15, 3 }
   0x4   : > { %p166_p2 = pnand %p703_p0, %p165_p1 }
   0x5   : > { %p195_p3 = scmp.lt.s32.totalorder (!%p166_p2), %s699_s16, 1  ;;  %s795_s23 = smov (!%p166_p2), 17  }
   0x6   : > { %169 = sbr.rel (%p166_p2) target bundleno = 739 (0x2e3), region = 32  ;;  %s796_s24 = smov (!%p166_p2), 111  }
   0x7   : > { %s797_s25 = smov (!%p166_p2), 110   ;;  %s798_s26 = smov (!%p166_p2), 112  }
   0x8   : > { %s799_s27 = smov (!%p166_p2), 96   ;;  %s800_s28 = smov (!%p166_p2), 95  }
   0x9   : > { %s801_s29 = smov (!%p166_p2), 94   ;;  %s802_s30 = smov (!%p166_p2), 126  }
   0xa   : > { %s803_s5 = smov (!%p166_p2), 127  }
   0xb   : > { %v212_v0 = vld [vmem:[%s959_s2] sm:$0xf]  ;;  %v791_v1 = vmov 0   ;;  %v792_v2 = vmov 1   ;;  %vm234_vm0 = vcmask 273408   ;;  %v793_v3 = vmov 0.0  }
   0xc   : > { %756 = vset.pattern.permute.xlu0 %v791_v1  ;;  %233 = vst [vmem:[#allocation2] sm:$0xff] %v793_v3  ;;  %s971_s16 = smov (!%p195_p3, %s699_s16), 1  ;;  %v794_v4 = vmov 839922192   ;;  %vm244_vm1 = vcmask 1043592   ;;  %vm245_vm2 = vcmask 1047556   ;;  %v250_v18 = vlaneseq }
   0xd   : > { %215 = vperm.xlu0 %756, %v212_v0   ;;  %235 = vst.msk [vmem:[#allocation2 + $0x8] sm:$0xf] %vm234_vm0, %v793_v3  ;;  %s840_s19 = sshll.u32 %s971_s16, 2  ;;  %v218_v5 = vunpack.c.l.s4 %v794_v4  ;;  %vm240_vm3 = vcmask 138240   ;;  %vm248_vm4 = vcmask 134144   ;;  %vm246_vm5 = vmor %vm245_vm2, %vm244_vm1  ;;  %vm321_vm8 = vcmask 1043456  }
   0xe   : > { %s199_s22 = scalar_lea.vmem %s957_s0, %s840_s19  ;;  %v846_v20 = vand.u32 127, %v250_v18  ;;  %vm408_vm9 = vcmask 908288   ;;  %vm428_vm10 = vcmask 900096   ;;  %vm372_vm13 = vcmask 916480   ;;  %s204_s10 = scalar_lea.vmem %s960_s3, %s840_s19 }
   0xf   : > { %v219_v7 = vunpack.c.0.s8 %v218_v5  ;;  %v210_v8 = vld [vmem:[%s199_s22] sm:$0xf]  ;;  %vm456_vm14 = vcmask 785408   ;;  %vm491_vm15 = vcmask 777216   ;;  %vm511_vm0 = vcmask 769024   ;;  %s208_s13 = scalar_lea.vmem %s961_s4, %s840_s19 }
  0x10   : > { %v211_v9 = vunpack.c.l.bf16 %v210_v8  ;;  %v849_v21 = vadd.s32 128, %v846_v20  ;;  %v257_v24 = vand.u32 15, %v846_v20  ;;  %vm323_vm1 = vcmask 1039360  }
  0x11   : > { %vm347_vm2 = vcmask 1031168  }
  0x12   : > { %v264_v25 = vand.u32 15, %v849_v21  ;;  %vm864_vm7 = vcmp.ge.s32.totalorder %v257_v24, 1  ;;  %vm904_vm11 = vcmp.le.s32.totalorder %v257_v24, 14 }
  0x14   : > { %vm858_vm6 = vcmp.ge.s32.totalorder %v264_v25, 1  ;;  %vm910_vm12 = vcmp.le.s32.totalorder %v264_v25, 14 }
  0x15   : > { %757 = vset.pattern.permute.xlu0 %v792_v2 }
  0x16   : > { %224 = vperm.xlu0 %757, %v212_v0  }
  0x7f   : > { %v216_v6 = vpop.permute.xlu0 %215 }
  0x80   : > { %v220_v10 = vperm.slane %v216_v6, %v219_v7 }
  0x82   : > { %v222_v12 = vmul.f32 %v220_v10, %v211_v9 }
  0x88   : > { %v225_v11 = vpop.permute.xlu0 %224 }
  0x89   : > { %v229_v13 = vperm.slane %v225_v11, %v219_v7 }
  0x8b   : > { %v231_v14 = vadd.f32 %v229_v13, %v222_v12 }
  0x8d   : > { %v232_v15 = vmax.f32 %v231_v14, 0.0 }
  0x8f   : > { %237 = vrot.lane.b32.xlu1 %v232_v15, %s795_s23 }
 0x101   : > { %v238_v16 = vpop.permute.xlu1 %237 }
 0x102   : > { %v239_v17 = vrot.slane %v238_v16, 4 }
 0x104   : > { %v241_v19 = vsel %vm240_vm3, %v239_v17, %v238_v16  ;;  %249 = vst.msk [vmem:[#allocation2 + $0x8] sm:$0xf] %vm248_vm4, %v239_v17  ;;  %vm555_vm3 = vcmask 1041408   ;;  %vm551_vm4 = vcmask 293888  }
 0x105   : > { %247 = vst.msk [vmem:[#allocation2] sm:$0xff] %vm246_vm5, %v241_v19  ;;  %vm602_vm5 = vcmask 3072  }
 0x10b   : > { %v297_v22 = vld [vmem:[#allocation2 + $0x8] sm:$0xf] }
 0x10c   : > { %v851_v23 = vld [vmem:[#allocation2] sm:$0xff]  ;;  %302 = vst [vmem:[#allocation1 + $0x10] ss:$2 sm:$0xff] %v297_v22  ;;  %v328_v31 = vld [vmem:[#allocation2 + $0x8] sm:$0xf] }
 0x10d   : > { %287 = vst [vmem:[#allocation1] ss:$2 sm:$0xff] %v851_v23  ;;  %v357_v35 = vld [vmem:[#allocation2 + $0x8] sm:$0xf] }
 0x10e   : > { %v385_v39 = vld [vmem:[#allocation2 + $0x8] sm:$0xf] }
 0x10f   : > { %v413_v43 = vld [vmem:[#allocation2 + $0x8] sm:$0xf] }
 0x110   : > { %v441_v48 = vld [vmem:[#allocation2 + $0x8] sm:$0xf] }
 0x111   : > { %v466_v53 = vld [vmem:[#allocation2 + $0x8] sm:$0xf] }
 0x112   : > { %v496_v57 = vld [vmem:[#allocation2 + $0x8] sm:$0xf] }
 0x113   : > { %v868_v28 = vld.sshfl [vmem:[#allocation1 + $0x10] sm:$0xff pattern:$0x75316420] }
 0x114   : > { %v288_v29 = vld.sshfl [vmem:[#allocation1] sm:$0xff pattern:$0x75316420]  ;;  %v289_v30 = vld.sshfl [vmem:[#allocation1 + $0x8] sm:$0xff pattern:$0x75316420]  ;;  %v310_v11 = vpack.c.bf16 %v868_v28, %v868_v28 }
 0x115   : > { %300 = vst [vmem:[#allocation1] ss:$2 sm:$0xff] %v851_v23  ;;  %v293_v32 = vsel %vm858_vm6, %v289_v30, 0.0  ;;  %v292_v33 = vsel %vm864_vm7, %v288_v29, 0.0 }
 0x116   : > { %337 = vst [vmem:[#allocation1 + $0x10] ss:$2 sm:$0xff] %v328_v31  ;;  %v294_v34 = vpack.c.bf16 %v293_v32, %v292_v33  ;;  %v314_v13 = vrot.slane %v310_v11, 6 }
 0x118   : > { %295 = vst [vmem:[#allocation3] sm:$0x33] %v294_v34 }
 0x11c   : > { %v875_v36 = vld.sshfl [vmem:[#allocation1] sm:$0xff pattern:$0x75316420]  ;;  %v877_v37 = vld.sshfl [vmem:[#allocation1 + $0x8] sm:$0xff pattern:$0x75316420] }
 0x11d   : > { %335 = vst [vmem:[#allocation1] ss:$2 sm:$0xff] %v851_v23  ;;  %v880_v38 = vld.sshfl [vmem:[#allocation1 + $0x10] sm:$0xff pattern:$0x75316420]  ;;  %v309_v12 = vpack.c.bf16 %v877_v37, %v875_v36 }
 0x11e   : > { %362 = vst [vmem:[#allocation1 + $0x10] ss:$2 sm:$0xff] %v357_v35 }
 0x11f   : > { %v313_v14 = vrot.slane %v309_v12, 6 }
 0x124   : > { %v882_v40 = vld.sshfl [vmem:[#allocation1] sm:$0xff pattern:$0x75316420]  ;;  %v884_v41 = vld.sshfl [vmem:[#allocation1 + $0x8] sm:$0xff pattern:$0x75316420] }
 0x125   : > { %360 = vst [vmem:[#allocation1] ss:$2 sm:$0xff] %v851_v23  ;;  %v365_v42 = vld.sshfl [vmem:[#allocation1 + $0x10] sm:$0xff pattern:$0x75316420]  ;;  %v778_v10 = vpack.i.bf16 %v884_v41, %v882_v40 }
 0x126   : > { %390 = vst [vmem:[#allocation1 + $0x10] ss:$2 sm:$0xff] %v385_v39 }
 0x12c   : > { %v363_v44 = vld.sshfl [vmem:[#allocation1] sm:$0xff pattern:$0x75316420]  ;;  %v364_v45 = vld.sshfl [vmem:[#allocation1 + $0x8] sm:$0xff pattern:$0x75316420] }
 0x12d   : > { %v393_v46 = vld.sshfl [vmem:[#allocation1 + $0x10] sm:$0xff pattern:$0x75316420]  ;;  %388 = vst [vmem:[#allocation1] ss:$2 sm:$0xff] %v851_v23  ;;  %v768_v9 = vpack.i.bf16 %v364_v45, %v363_v44 }
 0x12e   : > { %v398_v47 = vpack.c.bf16 %v393_v46, %v393_v46  ;;  %418 = vst [vmem:[#allocation1 + $0x10] ss:$2 sm:$0xff] %v413_v43 }
 0x130   : > { %403 = vrot.lane.b32.xlu0 %v398_v47, %s796_s24 }
 0x134   : > { %v391_v49 = vld.sshfl [vmem:[#allocation1] sm:$0xff pattern:$0x75316420]  ;;  %v392_v50 = vld.sshfl [vmem:[#allocation1 + $0x8] sm:$0xff pattern:$0x75316420] }
 0x135   : > { %v421_v51 = vld.sshfl [vmem:[#allocation1 + $0x10] sm:$0xff pattern:$0x75316420]  ;;  %v397_v52 = vpack.c.bf16 %v392_v50, %v391_v49  ;;  %416 = vst [vmem:[#allocation1] ss:$2 sm:$0xff] %v851_v23 }
 0x136   : > { %426 = vrot.lane.b32.xlu1 %v421_v51, %s797_s25  ;;  %446 = vst [vmem:[#allocation1 + $0x10] ss:$2 sm:$0xff] %v441_v48 }
 0x137   : > { %401 = vrot.lane.b32.xlu2 %v397_v52, %s796_s24 }
 0x138   : > { %370 = vrot.lane.b32.xlu0 %v365_v42, %s798_s26 }
 0x13c   : > { %v419_v54 = vld.sshfl [vmem:[#allocation1] sm:$0xff pattern:$0x75316420]  ;;  %v420_v55 = vld.sshfl [vmem:[#allocation1 + $0x8] sm:$0xff pattern:$0x75316420] }
 0x13d   : > { %444 = vst [vmem:[#allocation1] ss:$2 sm:$0xff] %v851_v23  ;;  %v449_v56 = vld.sshfl [vmem:[#allocation1 + $0x10] sm:$0xff pattern:$0x75316420]  ;;  %v758_v61 = vpack.i.bf16 %v420_v55, %v419_v54 }
 0x13e   : > { %471 = vst [vmem:[#allocation1 + $0x10] ss:$2 sm:$0xff] %v466_v53 }
 0x13f   : > { %454 = vrot.lane.b32.xlu2 %v449_v56, %s799_s27 }
 0x144   : > { %v447_v58 = vld.sshfl [vmem:[#allocation1] sm:$0xff pattern:$0x75316420]  ;;  %v448_v59 = vld.sshfl [vmem:[#allocation1 + $0x8] sm:$0xff pattern:$0x75316420] }
 0x145   : > { %v763_v60 = vpack.i.bf16 %v448_v59, %v447_v58  ;;  %469 = vst [vmem:[#allocation1] ss:$2 sm:$0xff] %v851_v23  ;;  %v474_v62 = vld.sshfl [vmem:[#allocation1 + $0x10] sm:$0xff pattern:$0x75316420] }
 0x146   : > { %501 = vst [vmem:[#allocation1 + $0x10] ss:$2 sm:$0xff] %v496_v57  ;;  %v479_v63 = vpack.c.bf16 %v474_v62, %v474_v62 }
 0x147   : > { %764 = vrot.lane.b32.xlu1 %v763_v60, %s799_s27  ;;  %759 = vrot.lane.b32.xlu2 %v758_v61, %s797_s25 }
 0x148   : > { %v483_v2 = vrot.slane %v479_v63, 6 }
 0x14c   : > { %v472_v0 = vld.sshfl [vmem:[#allocation1] sm:$0xff pattern:$0x75316420]  ;;  %v473_v1 = vld.sshfl [vmem:[#allocation1 + $0x8] sm:$0xff pattern:$0x75316420] }
 0x14d   : > { %v478_v3 = vpack.c.bf16 %v473_v1, %v472_v0  ;;  %499 = vst [vmem:[#allocation1] ss:$2 sm:$0xff] %v851_v23  ;;  %v504_v4 = vld.sshfl [vmem:[#allocation1 + $0x10] sm:$0xff pattern:$0x75316420] }
 0x14f   : > { %486 = vrot.lane.b32.xlu1 %v483_v2, %s800_s28  ;;  %509 = vrot.lane.b32.xlu2 %v504_v4, %s801_s29  ;;  %v482_v5 = vrot.slane %v478_v3, 6 }
 0x151   : > { %484 = vrot.lane.b32.xlu0 %v482_v5, %s800_s28 }
 0x154   : > { %v502_v6 = vld.sshfl [vmem:[#allocation1] sm:$0xff pattern:$0x75316420]  ;;  %v503_v7 = vld.sshfl [vmem:[#allocation1 + $0x8] sm:$0xff pattern:$0x75316420] }
 0x155   : > { %v773_v8 = vpack.i.bf16 %v503_v7, %v502_v6 }
 0x157   : > { %774 = vrot.lane.b32.xlu1 %v773_v8, %s801_s29  ;;  %769 = vrot.lane.b32.xlu2 %v768_v9, %s798_s26 }
 0x159   : > { %779 = vrot.lane.b32.xlu0 %v778_v10, %s802_s30 }
 0x15f   : > { %317 = vrot.lane.b32.xlu2 %v314_v13, %s803_s5  ;;  %315 = vrot.lane.b32.xlu1 %v313_v14, %s803_s5 }
 0x167   : > { %345 = vrot.lane.b32.xlu1 %v880_v38, %s802_s30 }
 0x191   : > { %v402_v15 = vpop.permute.xlu2 %401 }
 0x192   : > { %v405_v19 = vrot.slane %v402_v15, 4 }
 0x199   : > { %v455_v16 = vpop.permute.xlu2 %454 }
 0x1a1   : > { %v760_v17 = vpop.permute.xlu2 %759 }
 0x1a2   : > { %v404_v18 = vpop.permute.xlu0 %403  ;;  %v762_v23 = vunpack.i.h.bf16 %v760_v17  ;;  %v761_v28 = vunpack.i.l.bf16 %v760_v17 }
 0x1a3   : > { %v406_v22 = vrot.slane %v404_v18, 4 }
 0x1a4   : > { %v429_v33 = vsel %vm428_vm10, %v761_v28, %v762_v23 }
 0x1a5   : > { %v407_v29 = vsel %vm321_vm8, %v405_v19, %v406_v22  ;;  %v433_v37 = vsel %vm904_vm11, %v429_v33, 0.0 }
 0x1a6   : > { %v409_v30 = vsel %vm408_vm9, %v402_v15, %v407_v29 }
 0x1a7   : > { %411 = vst [vmem:[#allocation3 + $0x10] sm:$0x33] %v409_v30 }
 0x1a8   : > { %v427_v34 = vpop.permute.xlu1 %426 }
 0x1a9   : > { %v430_v35 = vsel %vm428_vm10, %v762_v23, %v427_v34  ;;  %v510_v36 = vpop.permute.xlu2 %509 }
 0x1aa   : > { %v434_v20 = vsel %vm910_vm12, %v430_v35, 0.0  ;;  %v371_v40 = vpop.permute.xlu0 %370 }
 0x1ab   : > { %v435_v24 = vpack.c.bf16 %v434_v20, %v433_v37 }
 0x1ad   : > { %v437_v38 = vrot.slane %v435_v24, 6 }
 0x1af   : > { %439 = vst [vmem:[#allocation3 + $0x10] sm:$0xcc] %v437_v38 }
 0x1b1   : > { %v770_v39 = vpop.permute.xlu2 %769 }
 0x1b2   : > { %v772_v21 = vunpack.i.h.bf16 %v770_v39  ;;  %v771_v25 = vunpack.i.l.bf16 %v770_v39 }
 0x1b4   : > { %v374_v41 = vsel %vm372_vm13, %v772_v21, %v371_v40  ;;  %v373_v42 = vsel %vm372_vm13, %v771_v25, %v772_v21  ;;  %v520_v25 = vld [vmem:[%s958_s1] sm:$0x3] }
 0x1b5   : > { %v378_v43 = vsel %vm858_vm6, %v374_v41, 0.0  ;;  %v377_v44 = vsel %vm864_vm7, %v373_v42, 0.0 }
 0x1b6   : > { %v379_v45 = vpack.c.bf16 %v378_v43, %v377_v44  ;;  %v719_v35 = vld [vmem:[#allocation3 + $0x10] sm:$0xf] }
 0x1b8   : > { %v381_v46 = vrot.slane %v379_v45, 6 }
 0x1b9   : > { %v765_v47 = vpop.permute.xlu1 %764  ;;  %v318_v3 = vpop.permute.xlu2 %317 }
 0x1ba   : > { %383 = vst [vmem:[#allocation3 + $0x8] sm:$0xcc] %v381_v46  ;;  %v767_v48 = vunpack.i.h.bf16 %v765_v47  ;;  %v766_v49 = vunpack.i.l.bf16 %v765_v47  ;;  %v320_v6 = vrot.slane %v318_v3, 4 }
 0x1bc   : > { %v457_v50 = vsel %vm456_vm14, %v766_v49, %v767_v48  ;;  %v458_v51 = vsel %vm456_vm14, %v767_v48, %v455_v16 }
 0x1bd   : > { %v461_v52 = vsel %vm864_vm7, %v457_v50, 0.0  ;;  %v462_v53 = vsel %vm858_vm6, %v458_v51, 0.0  ;;  %vm611_vm6 = vcmask 11272  }
 0x1be   : > { %v463_v54 = vpack.c.bf16 %v462_v53, %v461_v52 }
 0x1c0   : > { %464 = vst [vmem:[#allocation3 + $0x18] sm:$0x33] %v463_v54 }
 0x1c1   : > { %v487_v55 = vpop.permute.xlu1 %486 }
 0x1c2   : > { %v489_v57 = vrot.slane %v487_v55, 4 }
 0x1c3   : > { %v485_v56 = vpop.permute.xlu0 %484 }
 0x1c4   : > { %v488_v58 = vrot.slane %v485_v56, 4 }
 0x1c6   : > { %v490_v59 = vsel %vm321_vm8, %v488_v58, %v489_v57 }
 0x1c7   : > { %v492_v60 = vsel %vm491_vm15, %v485_v56, %v490_v59 }
 0x1c8   : > { %494 = vst [vmem:[#allocation3 + $0x18] sm:$0xcc] %v492_v60 }
 0x1c9   : > { %v775_v61 = vpop.permute.xlu1 %774 }
 0x1ca   : > { %v777_v62 = vunpack.i.h.bf16 %v775_v61  ;;  %v776_v63 = vunpack.i.l.bf16 %v775_v61 }
 0x1cb   : > { %v780_v4 = vpop.permute.xlu0 %779 }
 0x1cc   : > { %v512_v27 = vsel %vm511_vm0, %v776_v63, %v777_v62  ;;  %v513_v0 = vsel %vm511_vm0, %v777_v62, %v510_v36  ;;  %v782_v8 = vunpack.i.h.bf16 %v780_v4  ;;  %v781_v9 = vunpack.i.l.bf16 %v780_v4  ;;  %v733_v36 = vld [vmem:[#allocation3 + $0x14] sm:$0xf] }
 0x1cd   : > { %v516_v26 = vsel %vm904_vm11, %v512_v27, 0.0  ;;  %v517_v1 = vsel %vm910_vm12, %v513_v0, 0.0 }
 0x1ce   : > { %v518_v2 = vpack.c.bf16 %v517_v1, %v516_v26  ;;  %v348_v13 = vsel %vm347_vm2, %v781_v9, %v782_v8 }
 0x1cf   : > { %v352_v22 = vsel %vm904_vm11, %v348_v13, 0.0  ;;  %v734_v33 = vld [vmem:[#allocation3 + $0x14] sm:$0xf0]  ;;  %v721_v34 = vld [vmem:[#allocation3 + $0x18] sm:$0xf0] }
 0x1d0   : > { %519 = vst [vmem:[#allocation3 + $0x20] sm:$0x33] %v518_v2  ;;  %v720_v37 = vor.u32 %v734_v33, %v719_v35  ;;  %v724_v20 = vor.u32 %v733_v36, %v721_v34 }
 0x1d1   : > { %v316_v5 = vpop.permute.xlu1 %315 }
 0x1d2   : > { %v319_v7 = vrot.slane %v316_v5, 4 }
 0x1d4   : > { %v322_v10 = vsel %vm321_vm8, %v319_v7, %v320_v6 }
 0x1d5   : > { %v324_v11 = vsel %vm323_vm1, %v316_v5, %v322_v10 }
 0x1d6   : > { %326 = vst [vmem:[#allocation3] sm:$0xcc] %v324_v11 }
 0x1d7   : > { %v525_v12 = vld [vmem:[#allocation3 + $0x20] sm:$0x33] }
 0x1d8   : > { %v539_v14 = vunpack.c.l.b16 %v525_v12  ;;  %v540_v15 = vunpack.c.h.b16 %v525_v12 }
 0x1d9   : > { %v346_v16 = vpop.permute.xlu1 %345 }
 0x1da   : > { %v349_v17 = vsel %vm347_vm2, %v782_v8, %v346_v16  ;;  %v545_v18 = vpack.c.b16 %v539_v14, %v539_v14  ;;  %v546_v19 = vpack.c.b16 %v540_v15, %v540_v15 }
 0x1db   : > { %v353_v23 = vsel %vm910_vm12, %v349_v17, 0.0 }
 0x1dc   : > { %v354_v28 = vpack.c.bf16 %v353_v23, %v352_v22  ;;  %v557_v29 = vsel %vm555_vm3, %v545_v18, 0  ;;  %v560_v30 = vsel %vm555_vm3, %v546_v19, 0 }
 0x1dd   : > { %567 = vmatpush.bf16.msra.mxu0 %v557_v29  ;;  %580 = vmatpush.bf16.msra.mxu1 %v560_v30  ;;  %v711_v31 = vld [vmem:[#allocation3] sm:$0xf]  ;;  %v731_v32 = vld [vmem:[#allocation3 + $0x4] sm:$0xf] }
 0x1de   : > { %355 = vst [vmem:[#allocation3 + $0x8] sm:$0x33] %v354_v28 }
 0x1e1   : > { %568 = vmatpush.bf16.msra.mxu0 %v720_v37  ;;  %581 = vmatpush.bf16.msra.mxu1 %v724_v20 }
 0x1e5   : > { %v732_v24 = vld [vmem:[#allocation3 + $0x4] sm:$0xf0]  ;;  %v713_v38 = vld [vmem:[#allocation3 + $0x8] sm:$0xf0] }
 0x1e6   : > { %v712_v39 = vor.u32 %v732_v24, %v711_v31  ;;  %v716_v21 = vor.u32 %v731_v32, %v713_v38 }
 0x1e8   : > { %569 = vmatpush.bf16.msra.mxu0 %v712_v39  ;;  %582 = vmatpush.bf16.msra.mxu1 %v716_v21 }
 0x1eb   : > { %725 = vmatmul.msk.bf16.vlgmr.msra.gmra.mxu0 %vm551_vm4, %v520_v25  ;;  %726 = vmatmul.msk.bf16.vlgmr.msra.gmra.mxu1 %vm551_vm4, %v520_v25 }
 0x268   : > { %v571_v40 = vpop.f32.mrf.mxu0  ;;  %v584_v41 = vpop.f32.mrf.mxu1 }
 0x269   : > { %v604_v42 = vmul.f32 %v571_v40, %v571_v40  ;;  %v588_v43 = vpack.c.bf16 %v584_v41, %v571_v40  ;;  %v605_v44 = vmul.f32 %v584_v41, %v584_v41  ;;  %v597_v45 = vsel %vm321_vm8, %v571_v40, 0.0 }
 0x26a   : > { %v598_v46 = vsel %vm321_vm8, %v584_v41, 0.0 }
 0x26b   : > { %v590_v47 = vrot.slane %v588_v43, 2  ;;  %v599_v48 = vadd.f32 %v598_v46, %v597_v45  ;;  %v606_v49 = vsel %vm321_vm8, %v604_v42, 0.0  ;;  %v607_v50 = vsel %vm321_vm8, %v605_v44, 0.0 }
 0x26c   : > { %v608_v51 = vadd.f32 %v607_v50, %v606_v49 }
 0x26d   : > { %v593_v52 = vsel %vm555_vm3, %v588_v43, %v590_v47  ;;  %600 = vadd.xlane.f32.xlu2 %v599_v48 }
 0x26e   : > { %595 = vst [vmem:[%s204_s10] sm:$0xf] %v593_v52  ;;  %609 = vadd.xlane.f32.xlu0 %v608_v51 }
 0x270   : > { %v573_v53 = vpop.f32.mrf.mxu0  ;;  %v586_v54 = vpop.f32.mrf.mxu1 }
 0x2e0   : > { %v601_v55 = vpop.xlane.xlu2 %600 }
 0x2e1   : > { %603 = vst.msk [vmem:[%s208_s13] sm:$0xf] %vm602_vm5, %v601_v55  ;;  %v610_v56 = vpop.xlane.xlu0 %609 }
 0x2e2   : > { %612 = vst.msk [vmem:[%s208_s13] sm:$0xf] %vm611_vm6, %v610_v56 }
 0x2e3 PF: > { %s15_s15 = sadd.s32 1, %s789_s15  }
 0x2e4   : > { %p12_p4 = scmp.ge.s32.totalorder %s15_s15, 4  }
 0x2e6   :  { %14 = sbr.rel (!%p12_p4) target bundleno = 1 (0x1), region = 82 }

</bundles_post_ra>
